<compile_context>
chip_gen: v5e
topology: v5e:2x2
jax: 0.10.0
libtpu: 0.0.40
codegen_flags: <defaults>
</compile_context>

<pallas_src>
import math

import jax
import jax.numpy as jnp
from jax.experimental import pallas as pl
from jax.experimental.pallas import tpu as pltpu


# ----------------------------------------------------------------------------
# Pallas kernel: fused 3x3 "same" conv for ALL cell nodes at once
# ----------------------------------------------------------------------------
def _make_cell_conv_kernel(wp2: int, m: int):
    """wp2 = W + 2 (padded width); m = H * (W + 2) flat output rows / image."""

    def kernel(x_ref, w_ref, b_ref, o_ref, xf_ref):
        # x_ref  : (1, R, C)   bf16  flattened, spatially zero-padded NHWC image
        # w_ref  : (9, C, TCo) bf16  per-tap folded conv weights
        # b_ref  : (1, TCo)    f32   folded bias
        # o_ref  : (1, m, TCo) f32   flat conv output (2 junk cols per row)
        # xf_ref : (R, C)      f32   scratch: unpacked image (cheap unaligned
        #                            sublane slices on a 32-bit operand)
        xf_ref[...] = x_ref[0].astype(jnp.float32)     # one aligned full load

        # 9 taps, statically unrolled: each is a shifted row-window matmul.
        # Accumulate in registers (small M*TCo tile); bias folded into store.
        acc = None
        for t in range(9):
            dh, dw = divmod(t, 3)
            off = dh * wp2 + dw
            patch = xf_ref[off:off + m, :].astype(jnp.bfloat16)   # (m, C) bf16
            part = jnp.dot(patch, w_ref[t],
                           preferred_element_type=jnp.float32)    # (m, TCo) f32
            acc = part if acc is None else acc + part
        o_ref[0] = (acc + b_ref[...]).astype(o_ref.dtype)

    return kernel


def _pick_cout_tile(cout: int) -> int:
    for t in (512, 256, 128):
        if cout % t == 0:
            return t
    return cout                      # small Cout: block == full dim (allowed)


def conv3x3_same_fused(x_nchw, w9, bias):
    """Fused 3x3 stride-1 'same' conv.

    x_nchw : (N, C, H, W) f32, w9 : (9, C, Cout) bf16, bias : (Cout,) f32
    returns (N, Cout, H, W) f32
    """
    N, C, H, W = x_nchw.shape
    Cout = w9.shape[-1]
    wp2 = W + 2
    M = H * wp2                      # flat output rows / image (2 junk cols/row)
    R = (H + 2) * wp2 + 2            # flat padded-input rows / image

    # Cheap glue (fused by XLA under jit): NCHW -> NHWC, spatial zero-pad,
    # flatten spatial dims, bf16.  No im2col / no zero-padded tile copies.
    x = jnp.transpose(x_nchw, (0, 2, 3, 1)).astype(jnp.bfloat16)
    x = jnp.pad(x, ((0, 0), (1, 1), (1, 1), (0, 0)))
    x = jnp.pad(x.reshape(N, (H + 2) * wp2, C), ((0, 0), (0, 2), (0, 0)))

    tco = _pick_cout_tile(Cout)
    n_co = Cout // tco
    bias2 = bias.reshape(1, Cout).astype(jnp.float32)

    # TODO(synk): for very large H*W, add spatial tiling of M with a 2-row halo
    # via manual DMA (overlapping windows are not expressible with Blocked
    # BlockSpecs); for the shapes here one image per grid step fits VMEM easily.
    out_flat = pl.pallas_call(
        _make_cell_conv_kernel(wp2, M),
        out_shape=jax.ShapeDtypeStruct((N, M, Cout), jnp.float32),
        grid=(N, n_co),
        in_specs=[
            pl.BlockSpec((1, R, C), lambda n, co: (n, 0, 0)),
            pl.BlockSpec((9, C, tco), lambda n, co: (0, 0, co)),
            pl.BlockSpec((1, tco), lambda n, co: (0, co)),
        ],
        out_specs=pl.BlockSpec((1, M, tco), lambda n, co: (n, 0, co)),
        scratch_shapes=[
            pltpu.VMEM((R, C), jnp.float32),
        ],
        compiler_params=pltpu.CompilerParams(
            dimension_semantics=("parallel", "parallel")),
    )(x, w9, bias2)

    # Drop the 2 junk columns per output row, back to NCHW.
    out = out_flat.reshape(N, H, wp2, Cout)[:, :, :W, :]
    return jnp.transpose(out, (0, 3, 1, 2))


_jit_forward = jax.jit(conv3x3_same_fused)


# ----------------------------------------------------------------------------
# Cell (forward-pass port of nni.retiarii.nn.pytorch.Cell, default choices)
# ----------------------------------------------------------------------------
class PallasCell:
    def __init__(self, channels, num_nodes=4, num_ops_per_node=1,
                 num_predecessors=2, merge_op="all", concat_dim=1,
                 key=jax.random.PRNGKey(0)):
        assert merge_op in ("all", "loose_end")
        assert concat_dim == 1, "fused kernel specializes on channel concat"
        self.channels = channels
        self.num_nodes = num_nodes
        self.num_ops_per_node = num_ops_per_node
        self.num_predecessors = num_predecessors
        self.merge_op = merge_op
        self.concat_dim = concat_dim
        self.output_node_indices = list(
            range(num_predecessors, num_predecessors + num_nodes))

        # Each (node, op) slot owns an independent deep copy of the conv
        # candidate: PyTorch-style uniform(+-1/sqrt(fan_in)) init.
        fan_in = channels * 3 * 3
        bound = 1.0 / math.sqrt(fan_in)
        self.params = []
        for _ in range(num_nodes):
            node_params = []
            for _ in range(num_ops_per_node):
                key, wkey, bkey = jax.random.split(key, 3)
                w = jax.random.uniform(
                    wkey, (channels, channels, 3, 3), jnp.float32, -bound, bound)
                b = jax.random.uniform(
                    bkey, (channels,), jnp.float32, -bound, bound)
                node_params.append((w, b))
            self.params.append(node_params)

        # ---- fuse once at construction time --------------------------------
        # All ops of a node read the same input -> sum of convs == conv of
        # summed weights (exact). Stacking node weights along Cout makes the
        # final channel concat a no-op.
        node_w = [sum(w for w, _ in nps) for nps in self.params]   # (C, C, 3, 3)
        node_b = [sum(b for _, b in nps) for nps in self.params]   # (C,)
        w_fused = jnp.concatenate(node_w, axis=0)                  # (Cout, C, 3, 3)
        b_fused = jnp.concatenate(node_b, axis=0)                  # (Cout,)
        cout = num_nodes * channels
        # OIHW -> (kh, kw, ci, co) -> (9, C, Cout); bf16 for MXU streaming.
        self.w9 = jnp.transpose(w_fused, (2, 3, 1, 0)).reshape(
            9, channels, cout).astype(jnp.bfloat16)
        self.b_fused = b_fused.astype(jnp.float32)

    def __call__(self, *inputs):
        if len(inputs) == 1 and isinstance(inputs[0], (list, tuple)):
            inputs = list(inputs[0])
        else:
            inputs = list(inputs)
        assert len(inputs) == self.num_predecessors, \
            "The number of inputs must be equal to `num_predecessors`."
        # Default (un-mutated) choices: every node op reads states[0] ==
        # inputs[0]; with merge_op='all' (and also 'loose_end' in the
        # un-mutated base model) the output is exactly the fused conv.
        # TODO(synk): mutated InputChoice/LayerChoice branches (e.g. the
        # MaxPool2d candidate) are not exercised by the base model forward.
        return _jit_forward(inputs[0], self.w9, self.b_fused)

    # pure-JAX reference, faithful to the module structure (per-op convs,
    # per-node sum, channel concat), using bf16-rounded streamed operands so
    # the comparison against the bf16-fed kernel is tight.
    def reference(self, *inputs):
        if len(inputs) == 1 and isinstance(inputs[0], (list, tuple)):
            inputs = list(inputs[0])
        else:
            inputs = list(inputs)
        states = list(inputs)
        x_bf = states[0].astype(jnp.bfloat16).astype(jnp.float32)
        for node_params in self.params:
            cur = []
            for (w, b) in node_params:
                w_bf = w.astype(jnp.bfloat16).astype(jnp.float32)
                y = jax.lax.conv_general_dilated(
                    x_bf, w_bf, window_strides=(1, 1), padding="SAME",
                    dimension_numbers=("NCHW", "OIHW", "NCHW"))
                cur.append(y + b[None, :, None, None])
            states.append(jnp.sum(jnp.stack(cur), axis=0))
        return jnp.concatenate(states[self.num_predecessors:],
                               axis=self.concat_dim)


if __name__ == "__main__":
    key = jax.random.PRNGKey(0)
    k0, k1, kcell = jax.random.split(key, 3)

    N, C, H, W = 2, 4, 16, 16
    x0 = jax.random.normal(k0, (N, C, H, W), jnp.float32)
    x1 = jax.random.normal(k1, (N, C, H, W), jnp.float32)

    cell = PallasCell(channels=C, num_nodes=4, num_ops_per_node=1,
                      num_predecessors=2, merge_op="all", concat_dim=1,
                      key=kcell)

    out = jax.block_until_ready(cell([x0, x1]))
    ref = jax.block_until_ready(cell.reference([x0, x1]))

    assert out.shape == (N, C * cell.num_nodes, H, W), out.shape
    assert jnp.allclose(out, ref, atol=2e-3, rtol=2e-3), \
        float(jnp.max(jnp.abs(out - ref)))

    print("KERNEL_OK")
</pallas_src>

<mosaic_0001>
module attributes {stable_mosaic.version = 11 : i64} {
  func.func @kernel(%arg0: i32, %arg1: i32, %arg2: memref<1x326x4xbf16, #tpu.memory_space<vmem>>, %arg3: memref<9x4x16xbf16, #tpu.memory_space<vmem>>, %arg4: memref<1x16xf32, #tpu.memory_space<vmem>>, %arg5: memref<1x288x16xf32, #tpu.memory_space<vmem>>, %arg6: memref<326x4xf32, #tpu.memory_space<vmem>>) attributes {dimension_semantics = [#tpu.dimension_semantics<parallel>, #tpu.dimension_semantics<parallel>], iteration_bounds = array<i64: 2, 1>, scalar_prefetch = 0 : i64, scratch_operands = 1 : i64, tpu.core_type = #tpu.core_type<tc>, window_params = [{transform_indices = @transform_0, window_bounds = array<i64: 1, 326, 4>}, {transform_indices = @transform_1, window_bounds = array<i64: 9, 4, 16>}, {transform_indices = @transform_2, window_bounds = array<i64: 1, 16>}, {transform_indices = @transform_3, window_bounds = array<i64: 1, 288, 16>}]} {
    %c0 = arith.constant 0 : index
    %c0_0 = arith.constant 0 : index
    %c0_1 = arith.constant 0 : index
    %0 = vector.load %arg2[%c0, %c0_0, %c0_1] : memref<1x326x4xbf16, #tpu.memory_space<vmem>>, vector<1x326x4xbf16>
    %1 = vector.shape_cast %0 : vector<1x326x4xbf16> to vector<326x4xbf16>
    %2 = arith.extf %1 : vector<326x4xbf16> to vector<326x4xf32>
    %c0_2 = arith.constant 0 : index
    %c0_3 = arith.constant 0 : index
    %3 = vector.load %arg6[%c0_2, %c0_3] : memref<326x4xf32, #tpu.memory_space<vmem>>, vector<326x4xf32>
    tpu.vector_store %arg6[%c0_2, %c0_3], %2 {strides = array<i32>} : memref<326x4xf32, #tpu.memory_space<vmem>>, vector<326x4xf32>,
    %c0_4 = arith.constant 0 : index
    %c0_5 = arith.constant 0 : index
    %4 = vector.load %arg6[%c0_4, %c0_5] : memref<326x4xf32, #tpu.memory_space<vmem>>, vector<288x4xf32>
    %5 = arith.truncf %4 : vector<288x4xf32> to vector<288x4xbf16>
    %c0_6 = arith.constant 0 : index
    %c0_7 = arith.constant 0 : index
    %c0_8 = arith.constant 0 : index
    %6 = vector.load %arg3[%c0_6, %c0_7, %c0_8] : memref<9x4x16xbf16, #tpu.memory_space<vmem>>, vector<1x4x16xbf16>
    %7 = vector.shape_cast %6 : vector<1x4x16xbf16> to vector<4x16xbf16>
    %cst = arith.constant dense<0.000000e+00> : vector<288x16xf32>
    %8 = tpu.matmul %5, %7, %cst {dimension_numbers = #tpu.dot_dimension_numbers<[1], [0], [0], [1], [0, 0, 1, 1], [], []>} : vector<288x4xbf16>, vector<4x16xbf16>, vector<288x16xf32> -> vector<288x16xf32>
    %c1 = arith.constant 1 : index
    %c0_9 = arith.constant 0 : index
    %9 = vector.load %arg6[%c1, %c0_9] : memref<326x4xf32, #tpu.memory_space<vmem>>, vector<288x4xf32>
    %10 = arith.truncf %9 : vector<288x4xf32> to vector<288x4xbf16>
    %c1_10 = arith.constant 1 : index
    %c0_11 = arith.constant 0 : index
    %c0_12 = arith.constant 0 : index
    %11 = vector.load %arg3[%c1_10, %c0_11, %c0_12] : memref<9x4x16xbf16, #tpu.memory_space<vmem>>, vector<1x4x16xbf16>
    %12 = vector.shape_cast %11 : vector<1x4x16xbf16> to vector<4x16xbf16>
    %cst_13 = arith.constant dense<0.000000e+00> : vector<288x16xf32>
    %13 = tpu.matmul %10, %12, %cst_13 {dimension_numbers = #tpu.dot_dimension_numbers<[1], [0], [0], [1], [0, 0, 1, 1], [], []>} : vector<288x4xbf16>, vector<4x16xbf16>, vector<288x16xf32> -> vector<288x16xf32>
    %14 = arith.addf %8, %13 : vector<288x16xf32>
    %c2 = arith.constant 2 : index
    %c0_14 = arith.constant 0 : index
    %15 = vector.load %arg6[%c2, %c0_14] : memref<326x4xf32, #tpu.memory_space<vmem>>, vector<288x4xf32>
    %16 = arith.truncf %15 : vector<288x4xf32> to vector<288x4xbf16>
    %c2_15 = arith.constant 2 : index
    %c0_16 = arith.constant 0 : index
    %c0_17 = arith.constant 0 : index
    %17 = vector.load %arg3[%c2_15, %c0_16, %c0_17] : memref<9x4x16xbf16, #tpu.memory_space<vmem>>, vector<1x4x16xbf16>
    %18 = vector.shape_cast %17 : vector<1x4x16xbf16> to vector<4x16xbf16>
    %cst_18 = arith.constant dense<0.000000e+00> : vector<288x16xf32>
    %19 = tpu.matmul %16, %18, %cst_18 {dimension_numbers = #tpu.dot_dimension_numbers<[1], [0], [0], [1], [0, 0, 1, 1], [], []>} : vector<288x4xbf16>, vector<4x16xbf16>, vector<288x16xf32> -> vector<288x16xf32>
    %20 = arith.addf %14, %19 : vector<288x16xf32>
    %c18 = arith.constant 18 : index
    %c0_19 = arith.constant 0 : index
    %21 = vector.load %arg6[%c18, %c0_19] : memref<326x4xf32, #tpu.memory_space<vmem>>, vector<288x4xf32>
    %22 = arith.truncf %21 : vector<288x4xf32> to vector<288x4xbf16>
    %c3 = arith.constant 3 : index
    %c0_20 = arith.constant 0 : index
    %c0_21 = arith.constant 0 : index
    %23 = vector.load %arg3[%c3, %c0_20, %c0_21] : memref<9x4x16xbf16, #tpu.memory_space<vmem>>, vector<1x4x16xbf16>
    %24 = vector.shape_cast %23 : vector<1x4x16xbf16> to vector<4x16xbf16>
    %cst_22 = arith.constant dense<0.000000e+00> : vector<288x16xf32>
    %25 = tpu.matmul %22, %24, %cst_22 {dimension_numbers = #tpu.dot_dimension_numbers<[1], [0], [0], [1], [0, 0, 1, 1], [], []>} : vector<288x4xbf16>, vector<4x16xbf16>, vector<288x16xf32> -> vector<288x16xf32>
    %26 = arith.addf %20, %25 : vector<288x16xf32>
    %c19 = arith.constant 19 : index
    %c0_23 = arith.constant 0 : index
    %27 = vector.load %arg6[%c19, %c0_23] : memref<326x4xf32, #tpu.memory_space<vmem>>, vector<288x4xf32>
    %28 = arith.truncf %27 : vector<288x4xf32> to vector<288x4xbf16>
    %c4 = arith.constant 4 : index
    %c0_24 = arith.constant 0 : index
    %c0_25 = arith.constant 0 : index
    %29 = vector.load %arg3[%c4, %c0_24, %c0_25] : memref<9x4x16xbf16, #tpu.memory_space<vmem>>, vector<1x4x16xbf16>
    %30 = vector.shape_cast %29 : vector<1x4x16xbf16> to vector<4x16xbf16>
    %cst_26 = arith.constant dense<0.000000e+00> : vector<288x16xf32>
    %31 = tpu.matmul %28, %30, %cst_26 {dimension_numbers = #tpu.dot_dimension_numbers<[1], [0], [0], [1], [0, 0, 1, 1], [], []>} : vector<288x4xbf16>, vector<4x16xbf16>, vector<288x16xf32> -> vector<288x16xf32>
    %32 = arith.addf %26, %31 : vector<288x16xf32>
    %c20 = arith.constant 20 : index
    %c0_27 = arith.constant 0 : index
    %33 = vector.load %arg6[%c20, %c0_27] : memref<326x4xf32, #tpu.memory_space<vmem>>, vector<288x4xf32>
    %34 = arith.truncf %33 : vector<288x4xf32> to vector<288x4xbf16>
    %c5 = arith.constant 5 : index
    %c0_28 = arith.constant 0 : index
    %c0_29 = arith.constant 0 : index
    %35 = vector.load %arg3[%c5, %c0_28, %c0_29] : memref<9x4x16xbf16, #tpu.memory_space<vmem>>, vector<1x4x16xbf16>
    %36 = vector.shape_cast %35 : vector<1x4x16xbf16> to vector<4x16xbf16>
    %cst_30 = arith.constant dense<0.000000e+00> : vector<288x16xf32>
    %37 = tpu.matmul %34, %36, %cst_30 {dimension_numbers = #tpu.dot_dimension_numbers<[1], [0], [0], [1], [0, 0, 1, 1], [], []>} : vector<288x4xbf16>, vector<4x16xbf16>, vector<288x16xf32> -> vector<288x16xf32>
    %38 = arith.addf %32, %37 : vector<288x16xf32>
    %c36 = arith.constant 36 : index
    %c0_31 = arith.constant 0 : index
    %39 = vector.load %arg6[%c36, %c0_31] : memref<326x4xf32, #tpu.memory_space<vmem>>, vector<288x4xf32>
    %40 = arith.truncf %39 : vector<288x4xf32> to vector<288x4xbf16>
    %c6 = arith.constant 6 : index
    %c0_32 = arith.constant 0 : index
    %c0_33 = arith.constant 0 : index
    %41 = vector.load %arg3[%c6, %c0_32, %c0_33] : memref<9x4x16xbf16, #tpu.memory_space<vmem>>, vector<1x4x16xbf16>
    %42 = vector.shape_cast %41 : vector<1x4x16xbf16> to vector<4x16xbf16>
    %cst_34 = arith.constant dense<0.000000e+00> : vector<288x16xf32>
    %43 = tpu.matmul %40, %42, %cst_34 {dimension_numbers = #tpu.dot_dimension_numbers<[1], [0], [0], [1], [0, 0, 1, 1], [], []>} : vector<288x4xbf16>, vector<4x16xbf16>, vector<288x16xf32> -> vector<288x16xf32>
    %44 = arith.addf %38, %43 : vector<288x16xf32>
    %c37 = arith.constant 37 : index
    %c0_35 = arith.constant 0 : index
    %45 = vector.load %arg6[%c37, %c0_35] : memref<326x4xf32, #tpu.memory_space<vmem>>, vector<288x4xf32>
    %46 = arith.truncf %45 : vector<288x4xf32> to vector<288x4xbf16>
    %c7 = arith.constant 7 : index
    %c0_36 = arith.constant 0 : index
    %c0_37 = arith.constant 0 : index
    %47 = vector.load %arg3[%c7, %c0_36, %c0_37] : memref<9x4x16xbf16, #tpu.memory_space<vmem>>, vector<1x4x16xbf16>
    %48 = vector.shape_cast %47 : vector<1x4x16xbf16> to vector<4x16xbf16>
    %cst_38 = arith.constant dense<0.000000e+00> : vector<288x16xf32>
    %49 = tpu.matmul %46, %48, %cst_38 {dimension_numbers = #tpu.dot_dimension_numbers<[1], [0], [0], [1], [0, 0, 1, 1], [], []>} : vector<288x4xbf16>, vector<4x16xbf16>, vector<288x16xf32> -> vector<288x16xf32>
    %50 = arith.addf %44, %49 : vector<288x16xf32>
    %c38 = arith.constant 38 : index
    %c0_39 = arith.constant 0 : index
    %51 = vector.load %arg6[%c38, %c0_39] : memref<326x4xf32, #tpu.memory_space<vmem>>, vector<288x4xf32>
    %52 = arith.truncf %51 : vector<288x4xf32> to vector<288x4xbf16>
    %c8 = arith.constant 8 : index
    %c0_40 = arith.constant 0 : index
    %c0_41 = arith.constant 0 : index
    %53 = vector.load %arg3[%c8, %c0_40, %c0_41] : memref<9x4x16xbf16, #tpu.memory_space<vmem>>, vector<1x4x16xbf16>
    %54 = vector.shape_cast %53 : vector<1x4x16xbf16> to vector<4x16xbf16>
    %cst_42 = arith.constant dense<0.000000e+00> : vector<288x16xf32>
    %55 = tpu.matmul %52, %54, %cst_42 {dimension_numbers = #tpu.dot_dimension_numbers<[1], [0], [0], [1], [0, 0, 1, 1], [], []>} : vector<288x4xbf16>, vector<4x16xbf16>, vector<288x16xf32> -> vector<288x16xf32>
    %56 = arith.addf %50, %55 : vector<288x16xf32>
    %c0_43 = arith.constant 0 : index
    %c0_44 = arith.constant 0 : index
    %57 = vector.load %arg4[%c0_43, %c0_44] : memref<1x16xf32, #tpu.memory_space<vmem>>, vector<1x16xf32>
    %58 = vector.broadcast %57 : vector<1x16xf32> to vector<288x16xf32>
    %59 = arith.addf %56, %58 : vector<288x16xf32>
    %c0_45 = arith.constant 0 : index
    %c0_46 = arith.constant 0 : index
    %c0_47 = arith.constant 0 : index
    %60 = vector.load %arg5[%c0_45, %c0_46, %c0_47] : memref<1x288x16xf32, #tpu.memory_space<vmem>>, vector<1x288x16xf32>
    %61 = vector.shape_cast %60 : vector<1x288x16xf32> to vector<288x16xf32>
    %62 = vector.shape_cast %59 : vector<288x16xf32> to vector<1x288x16xf32>
    tpu.vector_store %arg5[%c0_45, %c0_46, %c0_47], %62 {strides = array<i32>} : memref<1x288x16xf32, #tpu.memory_space<vmem>>, vector<1x288x16xf32>,
    return
  }
  func.func @transform_0(%arg0: i32, %arg1: i32) -> (i32, i32, i32) {
    %c0_i32 = arith.constant 0 : i32
    %c0_i32_0 = arith.constant 0 : i32
    %c0_i32_1 = arith.constant 0 : i32
    return %arg0, %c0_i32, %c0_i32_0 : i32, i32, i32
  }
  func.func @transform_1(%arg0: i32, %arg1: i32) -> (i32, i32, i32) {
    %c0_i32 = arith.constant 0 : i32
    %c0_i32_0 = arith.constant 0 : i32
    %c0_i32_1 = arith.constant 0 : i32
    return %c0_i32, %c0_i32_0, %arg1 : i32, i32, i32
  }
  func.func @transform_2(%arg0: i32, %arg1: i32) -> (i32, i32) {
    %c0_i32 = arith.constant 0 : i32
    %c0_i32_0 = arith.constant 0 : i32
    return %c0_i32, %arg1 : i32, i32
  }
  func.func @transform_3(%arg0: i32, %arg1: i32) -> (i32, i32, i32) {
    %c0_i32 = arith.constant 0 : i32
    %c0_i32_0 = arith.constant 0 : i32
    return %arg0, %c0_i32, %arg1 : i32, i32, i32
  }
}

</mosaic_0001>

<bundles_post_ra>
// kernel: conv3x3_same_fused.1
= control target key start
LH: loop header
LB: loop body
LE: loop exit
PB: predicated region body
PF: predicated region fallthrough
CT: control target
= control target key end

     0   :  { %s3045_s12 = smov 0   ;;  %s3047_s13 = smov 0   ;;  %s3707_s0 = inlined_call_operand.vmem [shape: bf16[2,326,4], index: 0, kind: input, shape index: {}]   ;;  %s3708_s1 = inlined_call_operand.vmem [shape: bf16[9,4,16], index: 1, kind: input, shape index: {}]   ;;  %s3709_s2 = inlined_call_operand.vmem [shape: f32[1,16], index: 2, kind: input, shape index: {}]   ;;  %s3710_s3 = inlined_call_operand.vmem [shape: f32[2,288,16], index: 3, kind: output, shape index: {}]  }
   0x1   :  { %s3049_s14 = smov 0  }
   0x2 LB: > { %s25_s15 = sadd.s32 1, %s3019_s13  ;;  %p2696_p0 = scmp.ge.s32.totalorder %s3023_s14, 1  ;;  %s3023_s14 = sphi %s3049_s14, %s13_s14   ;;  %s3019_s13 = sphi %s3047_s13, %s3712_s13   ;;  %s3015_s12 = sphi %s3045_s12, %s3711_s12  }
   0x3   : > { %p27_p1 = scmp.ge.s32.totalorder %s25_s15, 2  ;;  %p168_p2 = scmp.lt.s32.totalorder %s3023_s14, 3 }
   0x5   : > { %s3714_s15 = smov (%p27_p1, %s25_s15), 0  ;;  %p169_p3 = pnand %p2696_p0, %p168_p2 }
   0x6   : > { %p202_p4 = scmp.lt.s32.totalorder (!%p169_p3), %s3015_s12, 1 }
   0x7   : > { %172 = sbr.rel (%p169_p3) target bundleno = 824 (0x338), region = 32 }
   0xc   : > { %v2699_v0 = vld [vmem:[%s3708_s1 + $0x2] sm:$0x3]  ;;  %vm513_vm0 = vcmask 1041408   ;;  %v2736_v2 = vld [vmem:[%s3708_s1 + $0x4] sm:$0x3]  ;;  %s3716_s12 = smov (!%p202_p4, %s3015_s12), 1 }
   0xd   : > { %v515_v1 = vsel %vm513_vm0, %v2699_v0, 0  ;;  %v402_v3 = vld [vmem:[%s3708_s1] sm:$0x3]  ;;  %v883_v4 = vsel %vm513_vm0, %v2736_v2, 0  ;;  %v2774_v6 = vld [vmem:[%s3708_s1 + $0x8] sm:$0x3] }
   0xe   : > { %2970 = vmatpush.bf16.msra.mxu1 %v515_v1  ;;  %2971 = vmatpush.bf16.msra.mxu2 %v515_v1  ;;  %v671_v5 = vsel %vm513_vm0, %v402_v3, 0  ;;  %v1379_v7 = vsel %vm513_vm0, %v2774_v6, 0  ;;  %s2973_s24 = smul.u32 164, %s3716_s12  ;;  %vm305_vm1 = vcmask 31744   ;;  %v2755_v54 = vld [vmem:[%s3708_s1 + $0x6] sm:$0x3] }
   0xf   : > { %524 = vmatpush.bf16.msra.mxu0 %v515_v1  ;;  %2972 = vmatpush.bf16.msra.mxu3 %v515_v1  ;;  %v1131_v57 = vsel %vm513_vm0, %v2755_v54, 0  ;;  %v2850_v54 = vld [vmem:[%s3708_s1 + $0x10] sm:$0x3]  ;;  %s2974_s11 = smul.u32 288, %s3716_s12  ;;  %vm2548_vm2 = vcmask 130048   ;;  %vm346_vm3 = vcmask 29696  }
  0x10   : > { %s3085_s27 = scalar_lea.vmem %s3707_s0, %s2973_s24 }
  0x11   : > { %v2955_v8 = vld [vmem:[%s3085_s27 + $0x28] sm:$0xff]   ;;  %v2956_v9 = vld [vmem:[%s3085_s27 + $0x30] sm:$0xff]   ;;  %v2961_v14 = vld [vmem:[%s3085_s27 + $0x58] sm:$0xff]   ;;  %s3515_s20 = scalar_lea.vmem %s3710_s3, %s2974_s11 }
  0x12   : > { %892 = vmatpush.bf16.msrb.mxu2 %v883_v4  ;;  %680 = vmatpush.bf16.msrb.mxu1 %v671_v5  ;;  %v2960_v10 = vld [vmem:[%s3085_s27 + $0x50] sm:$0xff]   ;;  %v2893_v11 = vunpack.c.l.bf16 %v2955_v8  ;;  %v2894_v12 = vunpack.c.h.bf16 %v2955_v8  ;;  %v2897_v13 = vunpack.c.l.bf16 %v2956_v9  ;;  %v2872_v16 = vld [vmem:[%s3085_s27] sm:$0xff]   ;;  %v2917_v18 = vunpack.c.l.bf16 %v2961_v14  ;;  %v2951_v19 = vld [vmem:[%s3085_s27 + $0x8] sm:$0xff]  }
  0x13   : > { %1388 = vmatpush.bf16.msrb.mxu0 %v1379_v7  ;;  %v2913_v15 = vunpack.c.l.bf16 %v2960_v10  ;;  %v2914_v17 = vunpack.c.h.bf16 %v2960_v10  ;;  %v2873_v20 = vunpack.c.l.bf16 %v2872_v16  ;;  %v2874_v21 = vunpack.c.h.bf16 %v2872_v16  ;;  %v2957_v22 = vld [vmem:[%s3085_s27 + $0x38] sm:$0xff]   ;;  %v2962_v25 = vld [vmem:[%s3085_s27 + $0x60] sm:$0xff]   ;;  %v2952_v28 = vld [vmem:[%s3085_s27 + $0x10] sm:$0xff]   ;;  %1140 = vmatpush.bf16.msrb.mxu3 %v1131_v57 }
  0x14   : > { %316 = vst.msk [vmem:[#allocation2 + $0x50] sm:$0xff] %vm305_vm1, %v2893_v11  ;;  %v2877_v23 = vunpack.c.l.bf16 %v2951_v19  ;;  %v2898_v24 = vunpack.c.h.bf16 %v2956_v9  ;;  %v2901_v26 = vunpack.c.l.bf16 %v2957_v22  ;;  %v2918_v27 = vunpack.c.h.bf16 %v2961_v14  ;;  %v2965_v31 = vld [vmem:[%s3085_s27 + $0x78] sm:$0xff]   ;;  %v2966_v36 = vld [vmem:[%s3085_s27 + $0x80] sm:$0xff]   ;;  %v2963_v46 = vld [vmem:[%s3085_s27 + $0x68] sm:$0xff]  }
  0x15   : > { %317 = vst.msk [vmem:[#allocation2 + $0x58] sm:$0xff] %vm305_vm1, %v2894_v12  ;;  %v2921_v30 = vunpack.c.l.bf16 %v2962_v25  ;;  %v2878_v33 = vunpack.c.h.bf16 %v2951_v19  ;;  %v2881_v35 = vunpack.c.l.bf16 %v2952_v28  ;;  %v2933_v38 = vunpack.c.l.bf16 %v2965_v31  ;;  %v2958_v41 = vld [vmem:[%s3085_s27 + $0x40] sm:$0xff]   ;;  %v2953_v51 = vld [vmem:[%s3085_s27 + $0x18] sm:$0xff]   ;;  %v2967_v55 = vld [vmem:[%s3085_s27 + $0x88] sm:$0xff]  }
  0x16   : > { %318 = vst.msk [vmem:[#allocation2 + $0x60] sm:$0xff] %vm305_vm1, %v2897_v13  ;;  %v2934_v40 = vunpack.c.h.bf16 %v2965_v31  ;;  %v2937_v43 = vunpack.c.l.bf16 %v2966_v36  ;;  %v2902_v45 = vunpack.c.h.bf16 %v2957_v22  ;;  %v2905_v48 = vunpack.c.l.bf16 %v2958_v41  ;;  %v2959_v59 = vld [vmem:[%s3085_s27 + $0x48] sm:$0xff]   ;;  %v2964_v0 = vld [vmem:[%s3085_s27 + $0x70] sm:$0xff]   ;;  %v2954_v8 = vld [vmem:[%s3085_s27 + $0x20] sm:$0xff]  }
  0x17   : > { %326 = vst.msk [vmem:[#allocation2 + $0xa0] sm:$0xff] %vm305_vm1, %v2913_v15  ;;  %v2922_v50 = vunpack.c.h.bf16 %v2962_v25  ;;  %v2925_v52 = vunpack.c.l.bf16 %v2963_v46  ;;  %v2882_v53 = vunpack.c.h.bf16 %v2952_v28  ;;  %v2885_v56 = vunpack.c.l.bf16 %v2953_v51  ;;  %v2968_v16 = vld [vmem:[%s3085_s27 + $0x90] sm:$0xff]  }
  0x18   : > { %327 = vst.msk [vmem:[#allocation2 + $0xa8] sm:$0xff] %vm305_vm1, %v2914_v17  ;;  %v2938_v58 = vunpack.c.h.bf16 %v2966_v36  ;;  %v2941_v62 = vunpack.c.l.bf16 %v2967_v55  ;;  %v2906_v63 = vunpack.c.h.bf16 %v2958_v41  ;;  %v2909_v3 = vunpack.c.l.bf16 %v2959_v59 }
  0x19   : > { %328 = vst.msk [vmem:[#allocation2 + $0xb0] sm:$0xff] %vm305_vm1, %v2917_v18  ;;  %v2926_v7 = vunpack.c.h.bf16 %v2963_v46  ;;  %v2929_v10 = vunpack.c.l.bf16 %v2964_v0  ;;  %v2886_v11 = vunpack.c.h.bf16 %v2953_v51  ;;  %v2889_v15 = vunpack.c.l.bf16 %v2954_v8  ;;  %v2793_v51 = vld [vmem:[%s3708_s1 + $0xa] sm:$0x3] }
  0x1a   : > { %306 = vst.msk [vmem:[#allocation2] sm:$0xff] %vm305_vm1, %v2873_v20  ;;  %v2942_v18 = vunpack.c.h.bf16 %v2967_v55  ;;  %v2945_v19 = vunpack.c.l.bf16 %v2968_v16  ;;  %v2946_v20 = vunpack.c.h.bf16 %v2968_v16  ;;  %v2371_v57 = vsel %vm513_vm0, %v2850_v54, 0 }
  0x1b   : > { %307 = vst.msk [vmem:[#allocation2 + $0x8] sm:$0xff] %vm305_vm1, %v2874_v21  ;;  %v2910_v21 = vunpack.c.h.bf16 %v2959_v59 }
  0x1c   : > { %v413_v29 = vld [vmem:[#allocation2 + $0x51] sm:$0xff]  ;;  %308 = vst.msk [vmem:[#allocation2 + $0x10] sm:$0xff] %vm305_vm1, %v2877_v23 }
  0x1d   : > { %v414_v32 = vld [vmem:[#allocation2 + $0x59] sm:$0xff]  ;;  %319 = vst.msk [vmem:[#allocation2 + $0x68] sm:$0xff] %vm305_vm1, %v2898_v24  ;;  %v2930_v24 = vunpack.c.h.bf16 %v2964_v0 }
  0x1e   : > { %v444_v34 = vpack.c.bf16 %v414_v32, %v413_v29  ;;  %320 = vst.msk [vmem:[#allocation2 + $0x70] sm:$0xff] %vm305_vm1, %v2901_v26 }
  0x1f   : > { %v423_v37 = vld [vmem:[#allocation2 + $0xa1] sm:$0xff]  ;;  %329 = vst.msk [vmem:[#allocation2 + $0xb8] sm:$0xff] %vm305_vm1, %v2918_v27  ;;  %v2890_v27 = vunpack.c.h.bf16 %v2954_v8 }
  0x20   : > { %2705 = vmatmul.msk.bf16.vlgmr.msra.gmra.mxu1 %vm305_vm1, %v444_v34  ;;  %v424_v39 = vld [vmem:[#allocation2 + $0xa9] sm:$0xff]  ;;  %330 = vst.msk [vmem:[#allocation2 + $0xc0] sm:$0xff] %vm305_vm1, %v2921_v30 }
  0x21   : > { %v449_v42 = vpack.c.bf16 %v424_v39, %v423_v37  ;;  %309 = vst.msk [vmem:[#allocation2 + $0x18] sm:$0xff] %vm305_vm1, %v2878_v33 }
  0x22   : > { %v403_v44 = vld [vmem:[#allocation2 + $0x1] sm:$0xff]  ;;  %310 = vst.msk [vmem:[#allocation2 + $0x20] sm:$0xff] %vm305_vm1, %v2881_v35 }
  0x23   : > { %2710 = vmatmul.msk.bf16.vlgmr.msra.gmra.mxu2 %vm305_vm1, %v449_v42  ;;  %v404_v47 = vld [vmem:[#allocation2 + $0x9] sm:$0xff]  ;;  %336 = vst.msk [vmem:[#allocation2 + $0xf0] sm:$0xff] %vm305_vm1, %v2933_v38 }
  0x24   : > { %v439_v49 = vpack.c.bf16 %v404_v47, %v403_v44  ;;  %337 = vst.msk [vmem:[#allocation2 + $0xf8] sm:$0xff] %vm305_vm1, %v2934_v40  ;;  %v415_v60 = vld [vmem:[#allocation2 + $0x61] sm:$0xff] }
  0x25   : > { %338 = vst.msk [vmem:[#allocation2 + $0x100] sm:$0xff] %vm305_vm1, %v2937_v43  ;;  %v416_v61 = vld [vmem:[#allocation2 + $0x69] sm:$0xff] }
  0x26   : > { %2700 = vmatmul.msk.bf16.vlgmr.msra.gmra.mxu0 %vm305_vm1, %v439_v49  ;;  %321 = vst.msk [vmem:[#allocation2 + $0x78] sm:$0xff] %vm305_vm1, %v2902_v45  ;;  %v425_v1 = vld [vmem:[#allocation2 + $0xb1] sm:$0xff]  ;;  %v445_v4 = vpack.c.bf16 %v416_v61, %v415_v60 }
  0x27   : > { %322 = vst.msk [vmem:[#allocation2 + $0x80] sm:$0xff] %vm305_vm1, %v2905_v48  ;;  %v426_v5 = vld [vmem:[#allocation2 + $0xb9] sm:$0xff]  ;;  %v2812_v48 = vld [vmem:[%s3708_s1 + $0xc] sm:$0x3]  ;;  %2380 = vmatpush.bf16.msra.mxu0 %v2371_v57 }
  0x28   : > { %331 = vst.msk [vmem:[#allocation2 + $0xc8] sm:$0xff] %vm305_vm1, %v2922_v50  ;;  %v450_v12 = vpack.c.bf16 %v426_v5, %v425_v1  ;;  %v405_v13 = vld [vmem:[#allocation2 + $0x11] sm:$0xff]  ;;  %v1875_v49 = vsel %vm513_vm0, %v2812_v48, 0  ;;  %v2831_v50 = vld [vmem:[%s3708_s1 + $0xe] sm:$0x3]  ;;  %v1277_v57 = vld [vmem:[#allocation2 + $0x5b] sm:$0xff] }
  0x29   : > { %332 = vst.msk [vmem:[#allocation2 + $0xd0] sm:$0xff] %vm305_vm1, %v2925_v52  ;;  %v406_v14 = vld [vmem:[#allocation2 + $0x19] sm:$0xff]  ;;  %1884 = vmatpush.bf16.msra.mxu2 %v1875_v49  ;;  %v2123_v52 = vsel %vm513_vm0, %v2831_v50, 0  ;;  %v1031_v48 = vld [vmem:[#allocation2 + $0x6a] sm:$0xff] }
  0x2a   : > { %311 = vst.msk [vmem:[#allocation2 + $0x28] sm:$0xff] %vm305_vm1, %v2882_v53  ;;  %v440_v17 = vpack.c.bf16 %v406_v14, %v405_v13  ;;  %v1627_v53 = vsel %vm513_vm0, %v2793_v51, 0  ;;  %v1020_v55 = vld [vmem:[#allocation2 + $0x12] sm:$0xff]  ;;  %v1269_v14 = vld [vmem:[#allocation2 + $0x1b] sm:$0xff] }
  0x2b   : > { %v433_v2 = vld [vmem:[#allocation2 + $0xf1] sm:$0xff]  ;;  %312 = vst.msk [vmem:[#allocation2 + $0x30] sm:$0xff] %vm305_vm1, %v2885_v56  ;;  %v1021_v56 = vld [vmem:[#allocation2 + $0x1a] sm:$0xff]  ;;  %1636 = vmatpush.bf16.msra.mxu1 %v1627_v53 }
  0x2c   : > { %v434_v6 = vld [vmem:[#allocation2 + $0xf9] sm:$0xff]  ;;  %339 = vst.msk [vmem:[#allocation2 + $0x108] sm:$0xff] %vm305_vm1, %v2938_v58  ;;  %v1056_v60 = vpack.c.bf16 %v1021_v56, %v1020_v55 }
  0x2d   : > { %v454_v9 = vpack.c.bf16 %v434_v6, %v433_v2  ;;  %340 = vst.msk [vmem:[#allocation2 + $0x110] sm:$0xff] %vm305_vm1, %v2941_v62  ;;  %v417_v25 = vld [vmem:[#allocation2 + $0x71] sm:$0xff]  ;;  %v348_v6 = vld [vmem:[#allocation2] sm:$0xff] }
  0x2e   : > { %323 = vst.msk [vmem:[#allocation2 + $0x88] sm:$0xff] %vm305_vm1, %v2906_v63  ;;  %v418_v26 = vld [vmem:[#allocation2 + $0x79] sm:$0xff] }
  0x2f   : > { %2715 = vmatmul.msk.bf16.vlgmr.msra.gmra.mxu3 %vm305_vm1, %v454_v9  ;;  %324 = vst.msk [vmem:[#allocation2 + $0x90] sm:$0xff] %vm305_vm1, %v2909_v3  ;;  %v446_v29 = vpack.c.bf16 %v418_v26, %v417_v25  ;;  %v427_v30 = vld [vmem:[#allocation2 + $0xc1] sm:$0xff]  ;;  %v1268_v13 = vld [vmem:[#allocation2 + $0x13] sm:$0xff] }
  0x30   : > { %2706 = vmatmul.msk.bf16.gmra.mxu1 %vm305_vm1, %v445_v4  ;;  %333 = vst.msk [vmem:[#allocation2 + $0xd8] sm:$0xff] %vm305_vm1, %v2926_v7  ;;  %v428_v31 = vld [vmem:[#allocation2 + $0xc9] sm:$0xff]  ;;  %2132 = vmatpush.bf16.msra.mxu3 %v2123_v52  ;;  %v1276_v56 = vld [vmem:[#allocation2 + $0x53] sm:$0xff] }
  0x31   : > { %334 = vst.msk [vmem:[#allocation2 + $0xe0] sm:$0xff] %vm305_vm1, %v2929_v10  ;;  %v451_v32 = vpack.c.bf16 %v428_v31, %v427_v30  ;;  %v407_v33 = vld [vmem:[#allocation2 + $0x21] sm:$0xff] }
  0x32   : > { %313 = vst.msk [vmem:[#allocation2 + $0x38] sm:$0xff] %vm305_vm1, %v2886_v11  ;;  %v408_v34 = vld [vmem:[#allocation2 + $0x29] sm:$0xff] }
  0x33   : > { %2711 = vmatmul.msk.bf16.gmra.mxu2 %vm305_vm1, %v450_v12  ;;  %314 = vst.msk [vmem:[#allocation2 + $0x40] sm:$0xff] %vm305_vm1, %v2889_v15  ;;  %v435_v22 = vld [vmem:[#allocation2 + $0x101] sm:$0xff]  ;;  %v441_v35 = vpack.c.bf16 %v408_v34, %v407_v33  ;;  %v1023_v5 = vld [vmem:[#allocation2 + $0x2a] sm:$0xff]  ;;  %v1304_v15 = vpack.c.bf16 %v1269_v14, %v1268_v13  ;;  %v1028_v34 = vld [vmem:[#allocation2 + $0x52] sm:$0xff] }
  0x34   : > { %341 = vst.msk [vmem:[#allocation2 + $0x118] sm:$0xff] %vm305_vm1, %v2942_v18  ;;  %v436_v23 = vld [vmem:[#allocation2 + $0x109] sm:$0xff] }
  0x35   : > { %342 = vst.msk [vmem:[#allocation2 + $0x120] sm:$0xff] %vm305_vm1, %v2945_v19  ;;  %v455_v28 = vpack.c.bf16 %v436_v23, %v435_v22  ;;  %v419_v38 = vld [vmem:[#allocation2 + $0x81] sm:$0xff]  ;;  %v773_v11 = vld [vmem:[#allocation2 + $0xa] sm:$0xff]  ;;  %v351_v19 = vld [vmem:[#allocation2 + $0x18] sm:$0xff] }
  0x36   : > { %2701 = vmatmul.msk.bf16.gmra.mxu0 %vm305_vm1, %v440_v17  ;;  %343 = vst.msk [vmem:[#allocation2 + $0x128] sm:$0xff] %vm305_vm1, %v2946_v20  ;;  %v420_v39 = vld [vmem:[#allocation2 + $0x89] sm:$0xff] }
  0x37   : > { %325 = vst.msk [vmem:[#allocation2 + $0x98] sm:$0xff] %vm305_vm1, %v2910_v21  ;;  %v447_v41 = vpack.c.bf16 %v420_v39, %v419_v38  ;;  %v429_v42 = vld [vmem:[#allocation2 + $0xd1] sm:$0xff]  ;;  %v1022_v4 = vld [vmem:[#allocation2 + $0x22] sm:$0xff] }
  0x38   : > { %335 = vst.msk [vmem:[#allocation2 + $0xe8] sm:$0xff] %vm305_vm1, %v2930_v24  ;;  %v430_v43 = vld [vmem:[#allocation2 + $0xd9] sm:$0xff]  ;;  %v349_v7 = vld [vmem:[#allocation2 + $0x8] sm:$0xff]  ;;  %v1057_v8 = vpack.c.bf16 %v1023_v5, %v1022_v4  ;;  %v350_v18 = vld [vmem:[#allocation2 + $0x10] sm:$0xff] }
  0x39   : > { %315 = vst.msk [vmem:[#allocation2 + $0x48] sm:$0xff] %vm305_vm1, %v2890_v27  ;;  %v452_v44 = vpack.c.bf16 %v430_v43, %v429_v42  ;;  %v409_v45 = vld [vmem:[#allocation2 + $0x31] sm:$0xff]  ;;  %v384_v9 = vpack.c.bf16 %v349_v7, %v348_v6  ;;  %v772_v10 = vld [vmem:[#allocation2 + $0x2] sm:$0xff]  ;;  %v385_v21 = vpack.c.bf16 %v351_v19, %v350_v18 }
  0x3a   : > { %v410_v46 = vld [vmem:[#allocation2 + $0x39] sm:$0xff]  ;;  %v808_v12 = vpack.c.bf16 %v773_v11, %v772_v10  ;;  %v1270_v22 = vld [vmem:[#allocation2 + $0x23] sm:$0xff]  ;;  %v1271_v23 = vld [vmem:[#allocation2 + $0x2b] sm:$0xff] }
  0x3b   : > { %v437_v36 = vld [vmem:[#allocation2 + $0x111] sm:$0xff]  ;;  %v442_v47 = vpack.c.bf16 %v410_v46, %v409_v45  ;;  %v1025_v17 = vld [vmem:[#allocation2 + $0x3a] sm:$0xff]  ;;  %v1305_v24 = vpack.c.bf16 %v1271_v23, %v1270_v22  ;;  %v361_v19 = vld [vmem:[#allocation2 + $0x68] sm:$0xff] }
  0x3c   : > { %v438_v37 = vld [vmem:[#allocation2 + $0x119] sm:$0xff]  ;;  %v1279_v10 = vld [vmem:[#allocation2 + $0x6b] sm:$0xff] }
  0x3d   : > { %v456_v40 = vpack.c.bf16 %v438_v37, %v437_v36  ;;  %v1024_v16 = vld [vmem:[#allocation2 + $0x32] sm:$0xff]  ;;  %v352_v27 = vld [vmem:[#allocation2 + $0x20] sm:$0xff] }
  0x3e   : > { %v421_v58 = vld [vmem:[#allocation2 + $0x91] sm:$0xff]  ;;  %v422_v59 = vld [vmem:[#allocation2 + $0x99] sm:$0xff]  ;;  %v1058_v20 = vpack.c.bf16 %v1025_v17, %v1024_v16  ;;  %v1034_v16 = vld [vmem:[#allocation2 + $0x82] sm:$0xff] }
  0x3f   : > { %2716 = vmatmul.msk.bf16.gmra.mxu3 %vm305_vm1, %v455_v28  ;;  %v448_v61 = vpack.c.bf16 %v422_v59, %v421_v58  ;;  %v431_v62 = vld [vmem:[#allocation2 + $0xe1] sm:$0xff]  ;;  %v432_v63 = vld [vmem:[#allocation2 + $0xe9] sm:$0xff]  ;;  %v1272_v31 = vld [vmem:[#allocation2 + $0x33] sm:$0xff]  ;;  %v1308_v58 = vpack.c.bf16 %v1277_v57, %v1276_v56 }
  0x40   : > { %2707 = vmatmul.msk.bf16.gmra.mxu1 %vm305_vm1, %v446_v29  ;;  %v453_v0 = vpack.c.bf16 %v432_v63, %v431_v62  ;;  %v411_v1 = vld [vmem:[#allocation2 + $0x41] sm:$0xff]  ;;  %v412_v2 = vld [vmem:[#allocation2 + $0x49] sm:$0xff]  ;;  %v355_v37 = vld [vmem:[#allocation2 + $0x38] sm:$0xff] }
  0x41   : > { %v443_v3 = vpack.c.bf16 %v412_v2, %v411_v1  ;;  %v1026_v25 = vld [vmem:[#allocation2 + $0x42] sm:$0xff]  ;;  %v1027_v26 = vld [vmem:[#allocation2 + $0x4a] sm:$0xff]  ;;  %v1032_v63 = vld [vmem:[#allocation2 + $0x72] sm:$0xff] }
  0x42   : > { %v353_v28 = vld [vmem:[#allocation2 + $0x28] sm:$0xff]  ;;  %v1059_v29 = vpack.c.bf16 %v1027_v26, %v1026_v25  ;;  %v354_v36 = vld [vmem:[#allocation2 + $0x30] sm:$0xff]  ;;  %v356_v49 = vld [vmem:[#allocation2 + $0x40] sm:$0xff] }
  0x43   : > { %2712 = vmatmul.msk.bf16.gmra.mxu2 %vm305_vm1, %v451_v32  ;;  %v386_v30 = vpack.c.bf16 %v353_v28, %v352_v27  ;;  %v1273_v32 = vld [vmem:[#allocation2 + $0x3b] sm:$0xff]  ;;  %v387_v39 = vpack.c.bf16 %v355_v37, %v354_v36  ;;  %v1275_v42 = vld [vmem:[#allocation2 + $0x4b] sm:$0xff]  ;;  %v1280_v26 = vld [vmem:[#allocation2 + $0x73] sm:$0xff] }
  0x44   : > { %v1306_v33 = vpack.c.bf16 %v1273_v32, %v1272_v31  ;;  %v357_v50 = vld [vmem:[#allocation2 + $0x48] sm:$0xff]  ;;  %v358_v1 = vld [vmem:[#allocation2 + $0x50] sm:$0xff]  ;;  %v359_v2 = vld [vmem:[#allocation2 + $0x58] sm:$0xff] }
  0x45   : > { %v388_v53 = vpack.c.bf16 %v357_v50, %v356_v49  ;;  %v389_v6 = vpack.c.bf16 %v359_v2, %v358_v1  ;;  %v1035_v17 = vld [vmem:[#allocation2 + $0x8a] sm:$0xff]  ;;  %v360_v18 = vld [vmem:[#allocation2 + $0x60] sm:$0xff]  ;;  %v363_v36 = vld [vmem:[#allocation2 + $0x78] sm:$0xff] }
  0x46   : > { %2702 = vmatmul.msk.bf16.gmra.mxu0 %vm305_vm1, %v441_v35  ;;  %v1029_v35 = vld [vmem:[#allocation2 + $0x5a] sm:$0xff]  ;;  %v1063_v22 = vpack.c.bf16 %v1035_v17, %v1034_v16  ;;  %v390_v23 = vpack.c.bf16 %v361_v19, %v360_v18  ;;  %v1038_v57 = vld [vmem:[#allocation2 + $0xa2] sm:$0xff] }
  0x47   : > { %v1060_v38 = vpack.c.bf16 %v1029_v35, %v1028_v34  ;;  %v1281_v27 = vld [vmem:[#allocation2 + $0x7b] sm:$0xff]  ;;  %v362_v35 = vld [vmem:[#allocation2 + $0x70] sm:$0xff] }
  0x48   : > { %v1310_v28 = vpack.c.bf16 %v1281_v27, %v1280_v26  ;;  %v1037_v34 = vld [vmem:[#allocation2 + $0x9a] sm:$0xff] }
  0x49   : > { %v1285_v16 = vld [vmem:[#allocation2 + $0x9b] sm:$0xff] }
  0x4f   : > { %2717 = vmatmul.msk.bf16.gmra.mxu3 %vm305_vm1, %v456_v40 }
  0x50   : > { %2708 = vmatmul.msk.bf16.gmra.mxu1 %vm305_vm1, %v447_v41  ;;  %v1274_v41 = vld [vmem:[#allocation2 + $0x43] sm:$0xff] }
  0x51   : > { %v1307_v43 = vpack.c.bf16 %v1275_v42, %v1274_v41  ;;  %v391_v41 = vpack.c.bf16 %v363_v36, %v362_v35  ;;  %v366_v36 = vld [vmem:[#allocation2 + $0x90] sm:$0xff] }
  0x53   : > { %2713 = vmatmul.msk.bf16.gmra.mxu2 %vm305_vm1, %v452_v44 }
  0x56   : > { %2703 = vmatmul.msk.bf16.gmra.mxu0 %vm305_vm1, %v442_v47  ;;  %v1030_v47 = vld [vmem:[#allocation2 + $0x62] sm:$0xff] }
  0x57   : > { %v1061_v52 = vpack.c.bf16 %v1031_v48, %v1030_v47  ;;  %v1282_v47 = vld [vmem:[#allocation2 + $0x83] sm:$0xff]  ;;  %v1283_v48 = vld [vmem:[#allocation2 + $0x8b] sm:$0xff] }
  0x58   : > { %v1311_v49 = vpack.c.bf16 %v1283_v48, %v1282_v47 }
  0x5f   : > { %2756 = vmatmul.msk.bf16.vlgmr.msrb.gmra.mxu3 %vm305_vm1, %v1056_v60 }
  0x60   : > { %2709 = vmatmul.msk.bf16.gmra.mxu1 %vm305_vm1, %v448_v61 }
  0x63   : > { %2714 = vmatmul.msk.bf16.gmra.mxu2 %vm305_vm1, %v453_v0  ;;  %v1033_v0 = vld [vmem:[#allocation2 + $0x7a] sm:$0xff] }
  0x64   : > { %v1062_v5 = vpack.c.bf16 %v1033_v0, %v1032_v63  ;;  %v364_v63 = vld [vmem:[#allocation2 + $0x80] sm:$0xff]  ;;  %v365_v0 = vld [vmem:[#allocation2 + $0x88] sm:$0xff] }
  0x66   : > { %2704 = vmatmul.msk.bf16.gmra.mxu0 %vm305_vm1, %v443_v3 }
  0x6f   : > { %2757 = vmatmul.msk.bf16.gmra.mxu3 %vm305_vm1, %v1057_v8 }
  0x70   : > { %2718 = vmatmul.msk.bf16.vlgmr.msrb.gmra.mxu1 %vm305_vm1, %v384_v9  ;;  %v1278_v9 = vld [vmem:[#allocation2 + $0x63] sm:$0xff] }
  0x71   : > { %v1309_v11 = vpack.c.bf16 %v1279_v10, %v1278_v9  ;;  %v392_v9 = vpack.c.bf16 %v365_v0, %v364_v63 }
  0x73   : > { %2737 = vmatmul.msk.bf16.vlgmr.msrb.gmra.mxu2 %vm305_vm1, %v808_v12 }
  0x76   : > { %2775 = vmatmul.msk.bf16.vlgmr.msrb.gmra.mxu0 %vm305_vm1, %v1304_v15 }
  0x7f   : > { %2758 = vmatmul.msk.bf16.gmra.mxu3 %vm305_vm1, %v1058_v20 }
  0x80   : > { %2719 = vmatmul.msk.bf16.gmra.mxu1 %vm305_vm1, %v385_v21 }
  0x83   : > { %2738 = vmatmul.msk.bf16.gmra.mxu2 %vm305_vm1, %v1056_v60 }
  0x86   : > { %2776 = vmatmul.msk.bf16.gmra.mxu0 %vm305_vm1, %v1305_v24 }
  0x8f   : > { %2759 = vmatmul.msk.bf16.gmra.mxu3 %vm305_vm1, %v1059_v29 }
  0x90   : > { %2720 = vmatmul.msk.bf16.gmra.mxu1 %vm305_vm1, %v386_v30 }
  0x93   : > { %2739 = vmatmul.msk.bf16.gmra.mxu2 %vm305_vm1, %v1057_v8 }
  0x96   : > { %2777 = vmatmul.msk.bf16.gmra.mxu0 %vm305_vm1, %v1306_v33  ;;  %v1036_v33 = vld [vmem:[#allocation2 + $0x92] sm:$0xff] }
  0x9d   : > { %v3195_v40 = vpop.f32.mrf.mxu1 }
  0x9f   : > { %2760 = vmatmul.msk.bf16.gmra.mxu3 %vm305_vm1, %v1060_v38 }
  0xa0   : > { %2721 = vmatmul.msk.bf16.gmra.mxu1 %vm305_vm1, %v387_v39  ;;  %v1064_v39 = vpack.c.bf16 %v1037_v34, %v1036_v33  ;;  %v1040_v33 = vld [vmem:[#allocation2 + $0xb2] sm:$0xff]  ;;  %v1041_v34 = vld [vmem:[#allocation2 + $0xba] sm:$0xff] }
  0xa3   : > { %v3199_v44 = vpop.f32.mrf.mxu0  ;;  %2740 = vmatmul.msk.bf16.gmra.mxu2 %vm305_vm1, %v1058_v20 }
  0xa5   : > { %v3202_v45 = vpop.f32.mrf.mxu1 }
  0xa6   : > { %2778 = vmatmul.msk.bf16.gmra.mxu0 %vm305_vm1, %v1307_v43  ;;  %v3205_v46 = vpop.f32.mrf.mxu2 }
  0xab   : > { %v3207_v51 = vpop.f32.mrf.mxu0 }
  0xad   : > { %v3209_v54 = vpop.f32.mrf.mxu1 }
  0xae   : > { %v3211_v55 = vpop.f32.mrf.mxu2 }
  0xaf   : > { %2761 = vmatmul.msk.bf16.gmra.mxu3 %vm305_vm1, %v1061_v52 }
  0xb0   : > { %2722 = vmatmul.msk.bf16.gmra.mxu1 %vm305_vm1, %v388_v53 }
  0xb2   : > { %v3215_v59 = vpop.f32.mrf.mxu3 }
  0xb3   : > { %v3217_v60 = vpop.f32.mrf.mxu0  ;;  %2741 = vmatmul.msk.bf16.gmra.mxu2 %vm305_vm1, %v1059_v29 }
  0xb5   : > { %v3220_v61 = vpop.f32.mrf.mxu1 }
  0xb6   : > { %2779 = vmatmul.msk.bf16.gmra.mxu0 %vm305_vm1, %v1308_v58  ;;  %v3223_v62 = vpop.f32.mrf.mxu2  ;;  %v1039_v58 = vld [vmem:[#allocation2 + $0xaa] sm:$0xff] }
  0xba   : > { %v3225_v3 = vpop.f32.mrf.mxu3 }
  0xbb   : > { %v3227_v4 = vpop.f32.mrf.mxu0 }
  0xbd   : > { %v3229_v7 = vpop.f32.mrf.mxu1 }
  0xbe   : > { %v3231_v8 = vpop.f32.mrf.mxu2 }
  0xbf   : > { %2762 = vmatmul.msk.bf16.gmra.mxu3 %vm305_vm1, %v1062_v5 }
  0xc0   : > { %2723 = vmatmul.msk.bf16.gmra.mxu1 %vm305_vm1, %v389_v6  ;;  %v3285_v6 = vpack.c.bf16 %v1039_v58, %v1038_v57 }
  0xc2   : > { %v3235_v12 = vpop.f32.mrf.mxu3 }
  0xc3   : > { %v3237_v13 = vpop.f32.mrf.mxu0  ;;  %2742 = vmatmul.msk.bf16.gmra.mxu2 %vm305_vm1, %v1060_v38 }
  0xc5   : > { %v3240_v14 = vpop.f32.mrf.mxu1 }
  0xc6   : > { %2780 = vmatmul.msk.bf16.gmra.mxu0 %vm305_vm1, %v1309_v11  ;;  %v3243_v15 = vpop.f32.mrf.mxu2 }
  0xca   : > { %v3245_v20 = vpop.f32.mrf.mxu3 }
  0xcb   : > { %v3247_v21 = vpop.f32.mrf.mxu0 }
  0xcd   : > { %v3249_v24 = vpop.f32.mrf.mxu1 }
  0xce   : > { %v3251_v25 = vpop.f32.mrf.mxu2 }
  0xcf   : > { %2763 = vmatmul.msk.bf16.gmra.mxu3 %vm305_vm1, %v1063_v22 }
  0xd0   : > { %2724 = vmatmul.msk.bf16.gmra.mxu1 %vm305_vm1, %v390_v23 }
  0xd2   : > { %v3255_v29 = vpop.f32.mrf.mxu3 }
  0xd3   : > { %v3257_v30 = vpop.f32.mrf.mxu0  ;;  %2743 = vmatmul.msk.bf16.gmra.mxu2 %vm305_vm1, %v1061_v52 }
  0xd5   : > { %v3260_v31 = vpop.f32.mrf.mxu1 }
  0xd6   : > { %2781 = vmatmul.msk.bf16.gmra.mxu0 %vm305_vm1, %v1310_v28  ;;  %v3263_v32 = vpop.f32.mrf.mxu2 }
  0xda   : > { %v3265_v37 = vpop.f32.mrf.mxu3 }
  0xdb   : > { %v3267_v38 = vpop.f32.mrf.mxu0 }
  0xdd   : > { %v3269_v42 = vpop.f32.mrf.mxu1 }
  0xde   : > { %v3271_v43 = vpop.f32.mrf.mxu2 }
  0xdf   : > { %2764 = vmatmul.msk.bf16.gmra.mxu3 %vm305_vm1, %v1064_v39 }
  0xe0   : > { %2725 = vmatmul.msk.bf16.gmra.mxu1 %vm305_vm1, %v391_v41  ;;  %v367_v41 = vld [vmem:[#allocation2 + $0x98] sm:$0xff] }
  0xe1   : > { %v393_v58 = vpack.c.bf16 %v367_v41, %v366_v36  ;;  %v369_v36 = vld [vmem:[#allocation2 + $0xa8] sm:$0xff] }
  0xe2   : > { %v1142_v50 = vpop.f32.mrf.mxu3 }
  0xe3   : > { %v3275_v52 = vpop.f32.mrf.mxu0  ;;  %2744 = vmatmul.msk.bf16.gmra.mxu2 %vm305_vm1, %v1062_v5  ;;  %v1284_v5 = vld [vmem:[#allocation2 + $0x93] sm:$0xff] }
  0xe4   : > { %v1312_v17 = vpack.c.bf16 %v1285_v16, %v1284_v5 }
  0xe5   : > { %v3278_v53 = vpop.f32.mrf.mxu1 }
  0xe6   : > { %2782 = vmatmul.msk.bf16.gmra.mxu0 %vm305_vm1, %v1311_v49  ;;  %v3281_v56 = vpop.f32.mrf.mxu2  ;;  %v3295_v49 = vpack.c.bf16 %v1041_v34, %v1040_v33  ;;  %v1043_v33 = vld [vmem:[#allocation2 + $0xca] sm:$0xff] }
  0xea   : > { %v1144_v1 = vpop.f32.mrf.mxu3 }
  0xeb   : > { %v3283_v2 = vpop.f32.mrf.mxu0 }
  0xed   : > { %v682_v10 = vpop.f32.mrf.mxu1 }
  0xee   : > { %v3287_v11 = vpop.f32.mrf.mxu2  ;;  %v683_v23 = vadd.f32 %v682_v10, %v3199_v44  ;;  %v1287_v10 = vld [vmem:[#allocation2 + $0xab] sm:$0xff] }
  0xef   : > { %2765 = vmatmul.msk.bf16.gmra.mxu3 %vm305_vm1, %v3285_v6 }
  0xf0   : > { %2726 = vmatmul.msk.bf16.gmra.mxu1 %vm305_vm1, %v392_v9  ;;  %v1286_v9 = vld [vmem:[#allocation2 + $0xa3] sm:$0xff] }
  0xf1   : > { %v1313_v5 = vpack.c.bf16 %v1287_v10, %v1286_v9  ;;  %v1289_v9 = vld [vmem:[#allocation2 + $0xbb] sm:$0xff] }
  0xf2   : > { %v1147_v18 = vpop.f32.mrf.mxu3 }
  0xf3   : > { %v1390_v19 = vpop.f32.mrf.mxu0  ;;  %2745 = vmatmul.msk.bf16.gmra.mxu2 %vm305_vm1, %v1063_v22 }
  0xf5   : > { %v684_v26 = vpop.f32.mrf.mxu1 }
  0xf6   : > { %2783 = vmatmul.msk.bf16.gmra.mxu0 %vm305_vm1, %v1312_v17  ;;  %v894_v27 = vpop.f32.mrf.mxu2  ;;  %v685_v22 = vadd.f32 %v684_v26, %v3207_v51 }
  0xf7   : > { %v984_v28 = vadd.f32 %v894_v27, %v683_v23 }
  0xf9   : > { %v1232_v35 = vadd.f32 %v1142_v50, %v984_v28  ;;  %v1042_v28 = vld [vmem:[#allocation2 + $0xc2] sm:$0xff] }
  0xfa   : > { %v1149_v47 = vpop.f32.mrf.mxu3 }
  0xfb   : > { %v1392_v48 = vpop.f32.mrf.mxu0  ;;  %v3297_v57 = vadd.f32 %v1390_v19, %v1232_v35  ;;  %v368_v35 = vld [vmem:[#allocation2 + $0xa0] sm:$0xff] }
  0xfd   : > { %v687_v44 = vpop.f32.mrf.mxu1 }
  0xfe   : > { %v896_v63 = vpop.f32.mrf.mxu2  ;;  %v688_v51 = vadd.f32 %v687_v44, %v3217_v60 }
  0xff   : > { %v985_v0 = vadd.f32 %v896_v63, %v685_v22  ;;  %2766 = vmatmul.msk.bf16.gmra.mxu3 %vm305_vm1, %v3295_v49 }
 0x100   : > { %2727 = vmatmul.msk.bf16.gmra.mxu1 %vm305_vm1, %v393_v58  ;;  %v3308_v58 = vpack.c.bf16 %v1043_v33, %v1042_v28  ;;  %v1045_v28 = vld [vmem:[#allocation2 + $0xda] sm:$0xff] }
 0x101   : > { %v1233_v50 = vadd.f32 %v1144_v1, %v985_v0  ;;  %v1288_v0 = vld [vmem:[#allocation2 + $0xb3] sm:$0xff] }
 0x102   : > { %v1152_v16 = vpop.f32.mrf.mxu3  ;;  %v1314_v10 = vpack.c.bf16 %v1289_v9, %v1288_v0  ;;  %v1291_v0 = vld [vmem:[#allocation2 + $0xcb] sm:$0xff] }
 0x103   : > { %v1395_v17 = vpop.f32.mrf.mxu0  ;;  %2746 = vmatmul.msk.bf16.gmra.mxu2 %vm305_vm1, %v1064_v39  ;;  %v3304_v19 = vadd.f32 %v1392_v48, %v1233_v50  ;;  %v394_v39 = vpack.c.bf16 %v369_v36, %v368_v35 }
 0x105   : > { %v689_v23 = vpop.f32.mrf.mxu1 }
 0x106   : > { %2784 = vmatmul.msk.bf16.gmra.mxu0 %vm305_vm1, %v1313_v5  ;;  %v899_v26 = vpop.f32.mrf.mxu2  ;;  %v690_v48 = vadd.f32 %v689_v23, %v3227_v4 }
 0x107   : > { %v986_v27 = vadd.f32 %v899_v26, %v688_v51 }
 0x109   : > { %v1234_v34 = vadd.f32 %v1147_v18, %v986_v27  ;;  %v1044_v27 = vld [vmem:[#allocation2 + $0xd2] sm:$0xff] }
 0x10a   : > { %v1154_v1 = vpop.f32.mrf.mxu3 }
 0x10b   : > { %v1397_v41 = vpop.f32.mrf.mxu0  ;;  %v3310_v22 = vadd.f32 %v1395_v17, %v1234_v34  ;;  %v370_v34 = vld [vmem:[#allocation2 + $0xb0] sm:$0xff] }
 0x10d   : > { %v692_v60 = vpop.f32.mrf.mxu1 }
 0x10e   : > { %v901_v44 = vpop.f32.mrf.mxu2  ;;  %v693_v4 = vadd.f32 %v692_v60, %v3237_v13 }
 0x10f   : > { %v987_v63 = vadd.f32 %v901_v44, %v690_v48  ;;  %2767 = vmatmul.msk.bf16.gmra.mxu3 %vm305_vm1, %v3308_v58 }
 0x110   : > { %2728 = vmatmul.msk.bf16.gmra.mxu1 %vm305_vm1, %v394_v39  ;;  %v3322_v39 = vpack.c.bf16 %v1045_v28, %v1044_v27  ;;  %v1047_v27 = vld [vmem:[#allocation2 + $0xea] sm:$0xff] }
 0x111   : > { %v1235_v18 = vadd.f32 %v1149_v47, %v987_v63  ;;  %v371_v47 = vld [vmem:[#allocation2 + $0xb8] sm:$0xff]  ;;  %v1290_v63 = vld [vmem:[#allocation2 + $0xc3] sm:$0xff] }
 0x112   : > { %v1157_v50 = vpop.f32.mrf.mxu3  ;;  %v1315_v9 = vpack.c.bf16 %v1291_v0, %v1290_v63  ;;  %v1293_v63 = vld [vmem:[#allocation2 + $0xdb] sm:$0xff] }
 0x113   : > { %v1400_v5 = vpop.f32.mrf.mxu0  ;;  %2747 = vmatmul.msk.bf16.gmra.mxu2 %vm305_vm1, %v3285_v6  ;;  %v3318_v17 = vadd.f32 %v1397_v41, %v1235_v18  ;;  %v395_v6 = vpack.c.bf16 %v371_v47, %v370_v34 }
 0x115   : > { %v694_v51 = vpop.f32.mrf.mxu1 }
 0x116   : > { %2785 = vmatmul.msk.bf16.gmra.mxu0 %vm305_vm1, %v1314_v10  ;;  %v904_v23 = vpop.f32.mrf.mxu2  ;;  %v695_v41 = vadd.f32 %v694_v51, %v3247_v21 }
 0x117   : > { %v988_v26 = vadd.f32 %v904_v23, %v693_v4 }
 0x119   : > { %v1236_v33 = vadd.f32 %v1152_v16, %v988_v26  ;;  %v1046_v26 = vld [vmem:[#allocation2 + $0xe2] sm:$0xff] }
 0x11a   : > { %v1159_v35 = vpop.f32.mrf.mxu3 }
 0x11b   : > { %v1402_v36 = vpop.f32.mrf.mxu0  ;;  %v3324_v48 = vadd.f32 %v1400_v5, %v1236_v33  ;;  %v372_v33 = vld [vmem:[#allocation2 + $0xc0] sm:$0xff] }
 0x11d   : > { %v697_v13 = vpop.f32.mrf.mxu1 }
 0x11e   : > { %v906_v60 = vpop.f32.mrf.mxu2  ;;  %v698_v21 = vadd.f32 %v697_v13, %v3257_v30 }
 0x11f   : > { %v989_v44 = vadd.f32 %v906_v60, %v695_v41  ;;  %2768 = vmatmul.msk.bf16.gmra.mxu3 %vm305_vm1, %v3322_v39 }
 0x120   : > { %2729 = vmatmul.msk.bf16.gmra.mxu1 %vm305_vm1, %v395_v6  ;;  %v3336_v6 = vpack.c.bf16 %v1047_v27, %v1046_v26  ;;  %v1049_v26 = vld [vmem:[#allocation2 + $0xfa] sm:$0xff] }
 0x121   : > { %v1237_v16 = vadd.f32 %v1154_v1, %v989_v44  ;;  %v373_v1 = vld [vmem:[#allocation2 + $0xc8] sm:$0xff]  ;;  %v1292_v44 = vld [vmem:[#allocation2 + $0xd3] sm:$0xff] }
 0x122   : > { %v1162_v18 = vpop.f32.mrf.mxu3  ;;  %v1316_v0 = vpack.c.bf16 %v1293_v63, %v1292_v44  ;;  %v1295_v44 = vld [vmem:[#allocation2 + $0xeb] sm:$0xff] }
 0x123   : > { %v1405_v10 = vpop.f32.mrf.mxu0  ;;  %2748 = vmatmul.msk.bf16.gmra.mxu2 %vm305_vm1, %v3295_v49  ;;  %v3332_v5 = vadd.f32 %v1402_v36, %v1237_v16  ;;  %v396_v49 = vpack.c.bf16 %v373_v1, %v372_v33 }
 0x125   : > { %v699_v4 = vpop.f32.mrf.mxu1 }
 0x126   : > { %2786 = vmatmul.msk.bf16.gmra.mxu0 %vm305_vm1, %v1315_v9  ;;  %v909_v51 = vpop.f32.mrf.mxu2  ;;  %v700_v36 = vadd.f32 %v699_v4, %v3267_v38 }
 0x127   : > { %v990_v23 = vadd.f32 %v909_v51, %v698_v21 }
 0x129   : > { %v1238_v28 = vadd.f32 %v1157_v50, %v990_v23  ;;  %v1048_v23 = vld [vmem:[#allocation2 + $0xf2] sm:$0xff] }
 0x12a   : > { %v1164_v34 = vpop.f32.mrf.mxu3 }
 0x12b   : > { %v1407_v47 = vpop.f32.mrf.mxu0  ;;  %v3338_v41 = vadd.f32 %v1405_v10, %v1238_v28  ;;  %v374_v28 = vld [vmem:[#allocation2 + $0xd0] sm:$0xff] }
 0x12d   : > { %v702_v30 = vpop.f32.mrf.mxu1 }
 0x12e   : > { %v911_v13 = vpop.f32.mrf.mxu2  ;;  %v703_v38 = vadd.f32 %v702_v30, %v3275_v52 }
 0x12f   : > { %v991_v60 = vadd.f32 %v911_v13, %v700_v36  ;;  %2769 = vmatmul.msk.bf16.gmra.mxu3 %vm305_vm1, %v3336_v6 }
 0x130   : > { %2730 = vmatmul.msk.bf16.gmra.mxu1 %vm305_vm1, %v396_v49  ;;  %v3350_v49 = vpack.c.bf16 %v1049_v26, %v1048_v23  ;;  %v1051_v23 = vld [vmem:[#allocation2 + $0x10a] sm:$0xff] }
 0x131   : > { %v1239_v50 = vadd.f32 %v1159_v35, %v991_v60  ;;  %v375_v35 = vld [vmem:[#allocation2 + $0xd8] sm:$0xff]  ;;  %v1294_v60 = vld [vmem:[#allocation2 + $0xe3] sm:$0xff] }
 0x132   : > { %v1167_v16 = vpop.f32.mrf.mxu3  ;;  %v1317_v63 = vpack.c.bf16 %v1295_v44, %v1294_v60  ;;  %v1297_v60 = vld [vmem:[#allocation2 + $0xfb] sm:$0xff] }
 0x133   : > { %v1410_v9 = vpop.f32.mrf.mxu0  ;;  %2749 = vmatmul.msk.bf16.gmra.mxu2 %vm305_vm1, %v3308_v58  ;;  %v3346_v10 = vadd.f32 %v1407_v47, %v1239_v50  ;;  %v397_v58 = vpack.c.bf16 %v375_v35, %v374_v28  ;;  %v2969_v44 = vld [vmem:[%s3085_s27 + $0x98] sm:$0xff]  }
 0x135   : > { %v704_v21 = vpop.f32.mrf.mxu1 }
 0x136   : > { %2787 = vmatmul.msk.bf16.gmra.mxu0 %vm305_vm1, %v1316_v0  ;;  %v914_v4 = vpop.f32.mrf.mxu2  ;;  %v705_v47 = vadd.f32 %v704_v21, %v3283_v2 }
 0x137   : > { %v992_v51 = vadd.f32 %v914_v4, %v703_v38 }
 0x139   : > { %v1240_v27 = vadd.f32 %v1162_v18, %v992_v51  ;;  %v1050_v51 = vld [vmem:[#allocation2 + $0x102] sm:$0xff] }
 0x13a   : > { %v1169_v33 = vpop.f32.mrf.mxu3 }
 0x13b   : > { %v1412_v1 = vpop.f32.mrf.mxu0  ;;  %v3352_v36 = vadd.f32 %v1410_v9, %v1240_v27  ;;  %v376_v27 = vld [vmem:[#allocation2 + $0xe0] sm:$0xff] }
 0x13d   : > { %v707_v52 = vpop.f32.mrf.mxu1 }
 0x13e   : > { %v916_v30 = vpop.f32.mrf.mxu2  ;;  %v708_v2 = vadd.f32 %v707_v52, %v3195_v40 }
 0x13f   : > { %v993_v13 = vadd.f32 %v916_v30, %v705_v47  ;;  %2770 = vmatmul.msk.bf16.gmra.mxu3 %vm305_vm1, %v3350_v49 }
 0x140   : > { %2731 = vmatmul.msk.bf16.gmra.mxu1 %vm305_vm1, %v397_v58  ;;  %v3364_v58 = vpack.c.bf16 %v1051_v23, %v1050_v51  ;;  %v1053_v23 = vld [vmem:[#allocation2 + $0x11a] sm:$0xff] }
 0x141   : > { %v1241_v18 = vadd.f32 %v1164_v34, %v993_v13  ;;  %v377_v34 = vld [vmem:[#allocation2 + $0xe8] sm:$0xff]  ;;  %v1296_v13 = vld [vmem:[#allocation2 + $0xf3] sm:$0xff] }
 0x142   : > { %v1172_v50 = vpop.f32.mrf.mxu3 }
 0x143   : > { %v1415_v0 = vpop.f32.mrf.mxu0  ;;  %2750 = vmatmul.msk.bf16.gmra.mxu2 %vm305_vm1, %v3322_v39  ;;  %v3360_v9 = vadd.f32 %v1412_v1, %v1241_v18  ;;  %v398_v1 = vpack.c.bf16 %v377_v34, %v376_v27  ;;  %v1318_v18 = vpack.c.bf16 %v1297_v60, %v1296_v13  ;;  %v378_v27 = vld [vmem:[#allocation2 + $0xf0] sm:$0xff]  ;;  %v379_v34 = vld [vmem:[#allocation2 + $0xf8] sm:$0xff]  ;;  %v1298_v60 = vld [vmem:[#allocation2 + $0x103] sm:$0xff] }
 0x145   : > { %v709_v38 = vpop.f32.mrf.mxu1 }
 0x146   : > { %2788 = vmatmul.msk.bf16.gmra.mxu0 %vm305_vm1, %v1317_v63  ;;  %v919_v21 = vpop.f32.mrf.mxu2  ;;  %v710_v40 = vadd.f32 %v709_v38, %v3202_v45 }
 0x147   : > { %v994_v4 = vadd.f32 %v919_v21, %v708_v2  ;;  %v2949_v2 = vunpack.c.l.bf16 %v2969_v44 }
 0x149   : > { %v1242_v26 = vadd.f32 %v1167_v16, %v994_v4  ;;  %344 = vst.msk [vmem:[#allocation2 + $0x130] sm:$0xff] %vm305_vm1, %v2949_v2 }
 0x14a   : > { %v1174_v28 = vpop.f32.mrf.mxu3 }
 0x14b   : > { %v1417_v35 = vpop.f32.mrf.mxu0  ;;  %v3366_v39 = vadd.f32 %v1415_v0, %v1242_v26 }
 0x14d   : > { %v712_v47 = vpop.f32.mrf.mxu1 }
 0x14e   : > { %v921_v52 = vpop.f32.mrf.mxu2  ;;  %v713_v38 = vadd.f32 %v712_v47, %v3209_v54 }
 0x14f   : > { %v995_v30 = vadd.f32 %v921_v52, %v710_v40  ;;  %2771 = vmatmul.msk.bf16.gmra.mxu3 %vm305_vm1, %v3364_v58 }
 0x150   : > { %2732 = vmatmul.msk.bf16.gmra.mxu1 %vm305_vm1, %v398_v1 }
 0x151   : > { %v1243_v16 = vadd.f32 %v1169_v33, %v995_v30  ;;  %v1052_v33 = vld [vmem:[#allocation2 + $0x112] sm:$0xff] }
 0x152   : > { %v1177_v63 = vpop.f32.mrf.mxu3  ;;  %v3380_v52 = vpack.c.bf16 %v1053_v23, %v1052_v33  ;;  %v1055_v33 = vld [vmem:[#allocation2 + $0x12a] sm:$0xff] }
 0x153   : > { %v1420_v0 = vpop.f32.mrf.mxu0  ;;  %2751 = vmatmul.msk.bf16.gmra.mxu2 %vm305_vm1, %v3336_v6  ;;  %v3375_v45 = vadd.f32 %v1417_v35, %v1243_v16  ;;  %v399_v35 = vpack.c.bf16 %v379_v34, %v378_v27  ;;  %v1299_v16 = vld [vmem:[#allocation2 + $0x10b] sm:$0xff] }
 0x154   : > { %v1319_v44 = vpack.c.bf16 %v1299_v16, %v1298_v60  ;;  %v1301_v60 = vld [vmem:[#allocation2 + $0x11b] sm:$0xff] }
 0x155   : > { %v714_v21 = vpop.f32.mrf.mxu1 }
 0x156   : > { %2789 = vmatmul.msk.bf16.gmra.mxu0 %vm305_vm1, %v1318_v18  ;;  %v924_v4 = vpop.f32.mrf.mxu2  ;;  %v715_v30 = vadd.f32 %v714_v21, %v3220_v61 }
 0x157   : > { %v996_v51 = vadd.f32 %v924_v4, %v713_v38 }
 0x159   : > { %v1244_v26 = vadd.f32 %v1172_v50, %v996_v51  ;;  %v1054_v51 = vld [vmem:[#allocation2 + $0x122] sm:$0xff] }
 0x15a   : > { %v1179_v1 = vpop.f32.mrf.mxu3 }
 0x15b   : > { %v1422_v40 = vpop.f32.mrf.mxu0  ;;  %v3382_v6 = vadd.f32 %v1420_v0, %v1244_v26  ;;  %v380_v26 = vld [vmem:[#allocation2 + $0x100] sm:$0xff] }
 0x15d   : > { %v717_v54 = vpop.f32.mrf.mxu1 }
 0x15e   : > { %v926_v47 = vpop.f32.mrf.mxu2  ;;  %v718_v61 = vadd.f32 %v717_v54, %v3229_v7 }
 0x15f   : > { %v997_v13 = vadd.f32 %v926_v47, %v715_v30  ;;  %2772 = vmatmul.msk.bf16.gmra.mxu3 %vm305_vm1, %v3380_v52 }
 0x160   : > { %2733 = vmatmul.msk.bf16.gmra.mxu1 %vm305_vm1, %v399_v35  ;;  %v1073_v35 = vpack.c.bf16 %v1055_v33, %v1054_v51  ;;  %v2013_v51 = vld [vmem:[#allocation2 + $0x2d] sm:$0xff] }
 0x161   : > { %v1245_v50 = vadd.f32 %v1174_v28, %v997_v13  ;;  %v381_v28 = vld [vmem:[#allocation2 + $0x108] sm:$0xff]  ;;  %v1300_v13 = vld [vmem:[#allocation2 + $0x113] sm:$0xff] }
 0x162   : > { %v1182_v18 = vpop.f32.mrf.mxu3  ;;  %v1320_v16 = vpack.c.bf16 %v1301_v60, %v1300_v13 }
 0x163   : > { %v1425_v2 = vpop.f32.mrf.mxu0  ;;  %2752 = vmatmul.msk.bf16.gmra.mxu2 %vm305_vm1, %v3350_v49  ;;  %v3390_v0 = vadd.f32 %v1422_v40, %v1245_v50  ;;  %v400_v49 = vpack.c.bf16 %v381_v28, %v380_v26 }
 0x165   : > { %v719_v38 = vpop.f32.mrf.mxu1 }
 0x166   : > { %2790 = vmatmul.msk.bf16.gmra.mxu0 %vm305_vm1, %v1319_v44  ;;  %v929_v21 = vpop.f32.mrf.mxu2  ;;  %v720_v40 = vadd.f32 %v719_v38, %v3240_v14 }
 0x167   : > { %v998_v4 = vadd.f32 %v929_v21, %v718_v61 }
 0x169   : > { %v1246_v23 = vadd.f32 %v1177_v63, %v998_v4  ;;  %v2012_v4 = vld [vmem:[#allocation2 + $0x25] sm:$0xff] }
 0x16a   : > { %v1184_v27 = vpop.f32.mrf.mxu3 }
 0x16b   : > { %v1427_v34 = vpop.f32.mrf.mxu0  ;;  %v3394_v30 = vadd.f32 %v1425_v2, %v1246_v23  ;;  %v382_v23 = vld [vmem:[#allocation2 + $0x110] sm:$0xff] }
 0x16d   : > { %v722_v47 = vpop.f32.mrf.mxu1 }
 0x16e   : > { %v931_v7 = vpop.f32.mrf.mxu2  ;;  %v723_v14 = vadd.f32 %v722_v47, %v3249_v24 }
 0x16f   : > { %v999_v54 = vadd.f32 %v931_v7, %v720_v40  ;;  %2773 = vmatmul.msk.bf16.gmra.mxu3 %vm305_vm1, %v1073_v35  ;;  %v2048_v35 = vpack.c.bf16 %v2013_v51, %v2012_v4  ;;  %v1302_v7 = vld [vmem:[#allocation2 + $0x123] sm:$0xff]  ;;  %v1516_v51 = vld [vmem:[#allocation2 + $0x14] sm:$0xff] }
 0x170   : > { %2734 = vmatmul.msk.bf16.gmra.mxu1 %vm305_vm1, %v400_v49 }
 0x171   : > { %v1247_v63 = vadd.f32 %v1179_v1, %v999_v54  ;;  %v383_v1 = vld [vmem:[#allocation2 + $0x118] sm:$0xff]  ;;  %v1303_v54 = vld [vmem:[#allocation2 + $0x12b] sm:$0xff] }
 0x172   : > { %v1187_v50 = vpop.f32.mrf.mxu3  ;;  %v1321_v13 = vpack.c.bf16 %v1303_v54, %v1302_v7  ;;  %v2260_v7 = vld [vmem:[#allocation2 + $0x26] sm:$0xff]  ;;  %v2261_v54 = vld [vmem:[#allocation2 + $0x2e] sm:$0xff] }
 0x173   : > { %v1430_v44 = vpop.f32.mrf.mxu0  ;;  %2753 = vmatmul.msk.bf16.gmra.mxu2 %vm305_vm1, %v3364_v58  ;;  %v3401_v2 = vadd.f32 %v1427_v34, %v1247_v63  ;;  %v401_v58 = vpack.c.bf16 %v383_v1, %v382_v23 }
 0x175   : > { %v724_v61 = vpop.f32.mrf.mxu1 }
 0x176   : > { %2791 = vmatmul.msk.bf16.gmra.mxu0 %vm305_vm1, %v1320_v16  ;;  %v934_v38 = vpop.f32.mrf.mxu2  ;;  %v725_v34 = vadd.f32 %v724_v61, %v3260_v31 }
 0x177   : > { %v1000_v21 = vadd.f32 %v934_v38, %v723_v14  ;;  %v2014_v38 = vld [vmem:[#allocation2 + $0x35] sm:$0xff] }
 0x179   : > { %v1248_v33 = vadd.f32 %v1182_v18, %v1000_v21  ;;  %v2015_v21 = vld [vmem:[#allocation2 + $0x3d] sm:$0xff] }
 0x17a   : > { %v1189_v26 = vpop.f32.mrf.mxu3  ;;  %v2049_v1 = vpack.c.bf16 %v2015_v21, %v2014_v38  ;;  %v2016_v38 = vld [vmem:[#allocation2 + $0x45] sm:$0xff]  ;;  %v2017_v21 = vld [vmem:[#allocation2 + $0x4d] sm:$0xff] }
 0x17b   : > { %v1432_v28 = vpop.f32.mrf.mxu0  ;;  %v3405_v49 = vadd.f32 %v1430_v44, %v1248_v33 }
 0x17d   : > { %v727_v40 = vpop.f32.mrf.mxu1 }
 0x17e   : > { %v936_v24 = vpop.f32.mrf.mxu2  ;;  %v728_v31 = vadd.f32 %v727_v40, %v3269_v42 }
 0x17f   : > { %v1001_v47 = vadd.f32 %v936_v24, %v725_v34  ;;  %2832 = vmatmul.msk.bf16.vlgmr.msra.gmra.mxu3 %vm305_vm1, %v2048_v35 }
 0x180   : > { %2735 = vmatmul.msk.bf16.gmra.mxu1 %vm305_vm1, %v401_v58  ;;  %v1765_v58 = vld [vmem:[#allocation2 + $0x2c] sm:$0xff] }
 0x181   : > { %v1249_v18 = vadd.f32 %v1184_v27, %v1001_v47  ;;  %v1517_v27 = vld [vmem:[#allocation2 + $0x1c] sm:$0xff] }
 0x182   : > { %v1192_v60 = vpop.f32.mrf.mxu3 }
 0x183   : > { %v1435_v63 = vpop.f32.mrf.mxu0  ;;  %2754 = vmatmul.msk.bf16.gmra.mxu2 %vm305_vm1, %v3380_v52  ;;  %v3412_v16 = vadd.f32 %v1432_v28, %v1249_v18  ;;  %v1552_v52 = vpack.c.bf16 %v1517_v27, %v1516_v51  ;;  %v1764_v28 = vld [vmem:[#allocation2 + $0x24] sm:$0xff]  ;;  %v2296_v18 = vpack.c.bf16 %v2261_v54, %v2260_v7 }
 0x184   : > { %v1800_v47 = vpack.c.bf16 %v1765_v58, %v1764_v28  ;;  %v1767_v28 = vld [vmem:[#allocation2 + $0x3c] sm:$0xff] }
 0x185   : > { %v729_v44 = vpop.f32.mrf.mxu1 }
 0x186   : > { %2792 = vmatmul.msk.bf16.gmra.mxu0 %vm305_vm1, %v1321_v13  ;;  %v939_v14 = vpop.f32.mrf.mxu2  ;;  %v730_v42 = vadd.f32 %v729_v44, %v3278_v53 }
 0x187   : > { %v1002_v61 = vadd.f32 %v939_v14, %v728_v31 }
 0x189   : > { %v1250_v4 = vadd.f32 %v1187_v50, %v1002_v61 }
 0x18a   : > { %v1194_v33 = vpop.f32.mrf.mxu3 }
 0x18b   : > { %v1437_v23 = vpop.f32.mrf.mxu0  ;;  %v3416_v35 = vadd.f32 %v1435_v63, %v1250_v4 }
 0x18d   : > { %v732_v34 = vpop.f32.mrf.mxu1 }
 0x18e   : > { %v941_v40 = vpop.f32.mrf.mxu2  ;;  %v733_v53 = vadd.f32 %v732_v34, %v3205_v46 }
 0x18f   : > { %v1003_v24 = vadd.f32 %v941_v40, %v730_v42  ;;  %2833 = vmatmul.msk.bf16.gmra.mxu3 %vm305_vm1, %v2049_v1  ;;  %v2262_v40 = vld [vmem:[#allocation2 + $0x36] sm:$0xff] }
 0x190   : > { %2794 = vmatmul.msk.bf16.vlgmr.msra.gmra.mxu1 %vm305_vm1, %v1552_v52  ;;  %v1766_v52 = vld [vmem:[#allocation2 + $0x34] sm:$0xff] }
 0x191   : > { %v1251_v50 = vadd.f32 %v1189_v26, %v1003_v24  ;;  %v2050_v26 = vpack.c.bf16 %v2017_v21, %v2016_v38  ;;  %v1801_v34 = vpack.c.bf16 %v1767_v28, %v1766_v52  ;;  %v2263_v24 = vld [vmem:[#allocation2 + $0x3e] sm:$0xff]  ;;  %v1769_v52 = vld [vmem:[#allocation2 + $0x4c] sm:$0xff] }
 0x192   : > { %v1197_v13 = vpop.f32.mrf.mxu3  ;;  %v2297_v7 = vpack.c.bf16 %v2263_v24, %v2262_v40 }
 0x193   : > { %v1440_v63 = vpop.f32.mrf.mxu0  ;;  %2813 = vmatmul.msk.bf16.vlgmr.msra.gmra.mxu2 %vm305_vm1, %v1800_v47  ;;  %v3422_v31 = vadd.f32 %v1437_v23, %v1251_v50 }
 0x195   : > { %v734_v44 = vpop.f32.mrf.mxu1 }
 0x196   : > { %2851 = vmatmul.msk.bf16.vlgmr.msra.gmra.mxu0 %vm305_vm1, %v2296_v18  ;;  %v944_v14 = vpop.f32.mrf.mxu2  ;;  %v735_v23 = vadd.f32 %v734_v44, %v3211_v55 }
 0x197   : > { %v1004_v61 = vadd.f32 %v944_v14, %v733_v53  ;;  %v2018_v14 = vld [vmem:[#allocation2 + $0x55] sm:$0xff] }
 0x199   : > { %v1252_v4 = vadd.f32 %v1192_v60, %v1004_v61  ;;  %v2019_v61 = vld [vmem:[#allocation2 + $0x5d] sm:$0xff] }
 0x19a   : > { %v1199_v51 = vpop.f32.mrf.mxu3 }
 0x19b   : > { %v1442_v27 = vpop.f32.mrf.mxu0  ;;  %v3426_v1 = vadd.f32 %v1440_v63, %v1252_v4 }
 0x19d   : > { %v737_v58 = vpop.f32.mrf.mxu1 }
 0x19e   : > { %v946_v42 = vpop.f32.mrf.mxu2  ;;  %v738_v55 = vadd.f32 %v737_v58, %v3223_v62 }
 0x19f   : > { %v1005_v46 = vadd.f32 %v946_v42, %v735_v23  ;;  %2834 = vmatmul.msk.bf16.gmra.mxu3 %vm305_vm1, %v2050_v26  ;;  %v1768_v26 = vld [vmem:[#allocation2 + $0x44] sm:$0xff] }
 0x1a0   : > { %2795 = vmatmul.msk.bf16.gmra.mxu1 %vm305_vm1, %v1800_v47  ;;  %v1802_v58 = vpack.c.bf16 %v1769_v52, %v1768_v26  ;;  %v2264_v42 = vld [vmem:[#allocation2 + $0x46] sm:$0xff]  ;;  %v1771_v26 = vld [vmem:[#allocation2 + $0x5c] sm:$0xff] }
 0x1a1   : > { %v1253_v60 = vadd.f32 %v1194_v33, %v1005_v46  ;;  %v2051_v33 = vpack.c.bf16 %v2019_v61, %v2018_v14  ;;  %v2265_v46 = vld [vmem:[#allocation2 + $0x4e] sm:$0xff] }
 0x1a2   : > { %v1202_v54 = vpop.f32.mrf.mxu3  ;;  %v2298_v40 = vpack.c.bf16 %v2265_v46, %v2264_v42 }
 0x1a3   : > { %v1445_v50 = vpop.f32.mrf.mxu0  ;;  %2814 = vmatmul.msk.bf16.gmra.mxu2 %vm305_vm1, %v1801_v34  ;;  %v3432_v18 = vadd.f32 %v1442_v27, %v1253_v60 }
 0x1a5   : > { %v739_v63 = vpop.f32.mrf.mxu1 }
 0x1a6   : > { %2852 = vmatmul.msk.bf16.gmra.mxu0 %vm305_vm1, %v2297_v7  ;;  %v949_v53 = vpop.f32.mrf.mxu2  ;;  %v740_v27 = vadd.f32 %v739_v63, %v3231_v8 }
 0x1a7   : > { %v1006_v44 = vadd.f32 %v949_v53, %v738_v55  ;;  %v2020_v53 = vld [vmem:[#allocation2 + $0x65] sm:$0xff] }
 0x1a9   : > { %v1254_v38 = vadd.f32 %v1197_v13, %v1006_v44  ;;  %v2021_v44 = vld [vmem:[#allocation2 + $0x6d] sm:$0xff] }
 0x1aa   : > { %v1204_v21 = vpop.f32.mrf.mxu3 }
 0x1ab   : > { %v1447_v47 = vpop.f32.mrf.mxu0  ;;  %v3436_v4 = vadd.f32 %v1445_v50, %v1254_v38 }
 0x1ad   : > { %v742_v28 = vpop.f32.mrf.mxu1 }
 0x1ae   : > { %v951_v23 = vpop.f32.mrf.mxu2  ;;  %v743_v8 = vadd.f32 %v742_v28, %v3243_v15 }
 0x1af   : > { %v1007_v62 = vadd.f32 %v951_v23, %v740_v27  ;;  %2835 = vmatmul.msk.bf16.gmra.mxu3 %vm305_vm1, %v2051_v33  ;;  %v1770_v33 = vld [vmem:[#allocation2 + $0x54] sm:$0xff] }
 0x1b0   : > { %2796 = vmatmul.msk.bf16.gmra.mxu1 %vm305_vm1, %v1801_v34  ;;  %v1803_v28 = vpack.c.bf16 %v1771_v26, %v1770_v33  ;;  %v2266_v23 = vld [vmem:[#allocation2 + $0x56] sm:$0xff]  ;;  %v1773_v33 = vld [vmem:[#allocation2 + $0x6c] sm:$0xff] }
 0x1b1   : > { %v1255_v13 = vadd.f32 %v1199_v51, %v1007_v62  ;;  %v2052_v51 = vpack.c.bf16 %v2021_v44, %v2020_v53  ;;  %v2267_v62 = vld [vmem:[#allocation2 + $0x5e] sm:$0xff] }
 0x1b2   : > { %v1207_v24 = vpop.f32.mrf.mxu3  ;;  %v2299_v42 = vpack.c.bf16 %v2267_v62, %v2266_v23 }
 0x1b3   : > { %v1450_v60 = vpop.f32.mrf.mxu0  ;;  %2815 = vmatmul.msk.bf16.gmra.mxu2 %vm305_vm1, %v1802_v58  ;;  %v3442_v7 = vadd.f32 %v1447_v47, %v1255_v13 }
 0x1b5   : > { %v744_v50 = vpop.f32.mrf.mxu1 }
 0x1b6   : > { %2853 = vmatmul.msk.bf16.gmra.mxu0 %vm305_vm1, %v2298_v40  ;;  %v954_v55 = vpop.f32.mrf.mxu2  ;;  %v745_v47 = vadd.f32 %v744_v50, %v3251_v25 }
 0x1b7   : > { %v1008_v63 = vadd.f32 %v954_v55, %v743_v8  ;;  %v2022_v55 = vld [vmem:[#allocation2 + $0x75] sm:$0xff] }
 0x1b9   : > { %v1256_v14 = vadd.f32 %v1202_v54, %v1008_v63  ;;  %v2023_v63 = vld [vmem:[#allocation2 + $0x7d] sm:$0xff] }
 0x1ba   : > { %v1209_v61 = vpop.f32.mrf.mxu3 }
 0x1bb   : > { %v1452_v34 = vpop.f32.mrf.mxu0  ;;  %v3446_v38 = vadd.f32 %v1450_v60, %v1256_v14 }
 0x1bd   : > { %v747_v52 = vpop.f32.mrf.mxu1 }
 0x1be   : > { %v956_v27 = vpop.f32.mrf.mxu2  ;;  %v748_v25 = vadd.f32 %v747_v52, %v3263_v32 }
 0x1bf   : > { %v1009_v15 = vadd.f32 %v956_v27, %v745_v47  ;;  %2836 = vmatmul.msk.bf16.gmra.mxu3 %vm305_vm1, %v2052_v51  ;;  %v1772_v51 = vld [vmem:[#allocation2 + $0x64] sm:$0xff] }
 0x1c0   : > { %2797 = vmatmul.msk.bf16.gmra.mxu1 %vm305_vm1, %v1802_v58  ;;  %v1804_v52 = vpack.c.bf16 %v1773_v33, %v1772_v51  ;;  %v2268_v27 = vld [vmem:[#allocation2 + $0x66] sm:$0xff]  ;;  %v1775_v51 = vld [vmem:[#allocation2 + $0x7c] sm:$0xff] }
 0x1c1   : > { %v1257_v54 = vadd.f32 %v1204_v21, %v1009_v15  ;;  %v2053_v21 = vpack.c.bf16 %v2023_v63, %v2022_v55  ;;  %v2269_v15 = vld [vmem:[#allocation2 + $0x6e] sm:$0xff] }
 0x1c2   : > { %v1212_v46 = vpop.f32.mrf.mxu3  ;;  %v2300_v23 = vpack.c.bf16 %v2269_v15, %v2268_v27 }
 0x1c3   : > { %v1455_v13 = vpop.f32.mrf.mxu0  ;;  %2816 = vmatmul.msk.bf16.gmra.mxu2 %vm305_vm1, %v1803_v28  ;;  %v3452_v40 = vadd.f32 %v1452_v34, %v1257_v54 }
 0x1c5   : > { %v749_v60 = vpop.f32.mrf.mxu1 }
 0x1c6   : > { %2854 = vmatmul.msk.bf16.gmra.mxu0 %vm305_vm1, %v2299_v42  ;;  %v959_v8 = vpop.f32.mrf.mxu2  ;;  %v750_v34 = vadd.f32 %v749_v60, %v3271_v43 }
 0x1c7   : > { %v1010_v50 = vadd.f32 %v959_v8, %v748_v25  ;;  %v2024_v8 = vld [vmem:[#allocation2 + $0x85] sm:$0xff] }
 0x1c9   : > { %v1258_v53 = vadd.f32 %v1207_v24, %v1010_v50  ;;  %v2025_v50 = vld [vmem:[#allocation2 + $0x8d] sm:$0xff] }
 0x1ca   : > { %v1214_v44 = vpop.f32.mrf.mxu3 }
 0x1cb   : > { %v1457_v58 = vpop.f32.mrf.mxu0  ;;  %v3456_v14 = vadd.f32 %v1455_v13, %v1258_v53 }
 0x1cd   : > { %v752_v26 = vpop.f32.mrf.mxu1 }
 0x1ce   : > { %v961_v47 = vpop.f32.mrf.mxu2  ;;  %v753_v43 = vadd.f32 %v752_v26, %v3281_v56 }
 0x1cf   : > { %v1011_v32 = vadd.f32 %v961_v47, %v750_v34  ;;  %2837 = vmatmul.msk.bf16.gmra.mxu3 %vm305_vm1, %v2053_v21  ;;  %v1774_v21 = vld [vmem:[#allocation2 + $0x74] sm:$0xff] }
 0x1d0   : > { %2798 = vmatmul.msk.bf16.gmra.mxu1 %vm305_vm1, %v1803_v28  ;;  %v1805_v26 = vpack.c.bf16 %v1775_v51, %v1774_v21  ;;  %v2270_v47 = vld [vmem:[#allocation2 + $0x76] sm:$0xff]  ;;  %v1777_v21 = vld [vmem:[#allocation2 + $0x8c] sm:$0xff] }
 0x1d1   : > { %v1259_v24 = vadd.f32 %v1209_v61, %v1011_v32  ;;  %v2054_v61 = vpack.c.bf16 %v2025_v50, %v2024_v8  ;;  %v2271_v32 = vld [vmem:[#allocation2 + $0x7e] sm:$0xff] }
 0x1d2   : > { %v1217_v62 = vpop.f32.mrf.mxu3  ;;  %v2301_v27 = vpack.c.bf16 %v2271_v32, %v2270_v47 }
 0x1d3   : > { %v1460_v54 = vpop.f32.mrf.mxu0  ;;  %2817 = vmatmul.msk.bf16.gmra.mxu2 %vm305_vm1, %v1804_v52  ;;  %v3462_v42 = vadd.f32 %v1457_v58, %v1259_v24 }
 0x1d5   : > { %v754_v13 = vpop.f32.mrf.mxu1 }
 0x1d6   : > { %2855 = vmatmul.msk.bf16.gmra.mxu0 %vm305_vm1, %v2300_v23  ;;  %v964_v25 = vpop.f32.mrf.mxu2  ;;  %v755_v58 = vadd.f32 %v754_v13, %v3287_v11 }
 0x1d7   : > { %v1012_v60 = vadd.f32 %v964_v25, %v753_v43  ;;  %v2026_v25 = vld [vmem:[#allocation2 + $0x95] sm:$0xff] }
 0x1d9   : > { %v1260_v55 = vadd.f32 %v1212_v46, %v1012_v60  ;;  %v2027_v60 = vld [vmem:[#allocation2 + $0x9d] sm:$0xff] }
 0x1da   : > { %v1219_v63 = vpop.f32.mrf.mxu3 }
 0x1db   : > { %v1462_v28 = vpop.f32.mrf.mxu0  ;;  %v3466_v53 = vadd.f32 %v1460_v54, %v1260_v55 }
 0x1dd   : > { %v757_v33 = vpop.f32.mrf.mxu1 }
 0x1de   : > { %v966_v34 = vpop.f32.mrf.mxu2  ;;  %v758_v11 = vadd.f32 %v757_v33, %v3215_v59 }
 0x1df   : > { %v1013_v56 = vadd.f32 %v966_v34, %v755_v58  ;;  %2838 = vmatmul.msk.bf16.gmra.mxu3 %vm305_vm1, %v2054_v61  ;;  %v1776_v61 = vld [vmem:[#allocation2 + $0x84] sm:$0xff] }
 0x1e0   : > { %2799 = vmatmul.msk.bf16.gmra.mxu1 %vm305_vm1, %v1804_v52  ;;  %v1806_v33 = vpack.c.bf16 %v1777_v21, %v1776_v61  ;;  %v2272_v34 = vld [vmem:[#allocation2 + $0x86] sm:$0xff]  ;;  %v1779_v61 = vld [vmem:[#allocation2 + $0x9c] sm:$0xff] }
 0x1e1   : > { %v1261_v46 = vadd.f32 %v1214_v44, %v1013_v56  ;;  %v2055_v44 = vpack.c.bf16 %v2027_v60, %v2026_v25  ;;  %v2273_v56 = vld [vmem:[#allocation2 + $0x8e] sm:$0xff] }
 0x1e2   : > { %v1222_v15 = vpop.f32.mrf.mxu3  ;;  %v2302_v47 = vpack.c.bf16 %v2273_v56, %v2272_v34 }
 0x1e3   : > { %v1465_v24 = vpop.f32.mrf.mxu0  ;;  %2818 = vmatmul.msk.bf16.gmra.mxu2 %vm305_vm1, %v1805_v26  ;;  %v3472_v23 = vadd.f32 %v1462_v28, %v1261_v46 }
 0x1e5   : > { %v759_v54 = vpop.f32.mrf.mxu1 }
 0x1e6   : > { %2856 = vmatmul.msk.bf16.gmra.mxu0 %vm305_vm1, %v2301_v27  ;;  %v969_v43 = vpop.f32.mrf.mxu2  ;;  %v760_v28 = vadd.f32 %v759_v54, %v3225_v3 }
 0x1e7   : > { %v1014_v13 = vadd.f32 %v969_v43, %v758_v11  ;;  %v2028_v43 = vld [vmem:[#allocation2 + $0xa5] sm:$0xff] }
 0x1e9   : > { %v1262_v8 = vadd.f32 %v1217_v62, %v1014_v13  ;;  %v2029_v13 = vld [vmem:[#allocation2 + $0xad] sm:$0xff] }
 0x1ea   : > { %v1224_v50 = vpop.f32.mrf.mxu3 }
 0x1eb   : > { %v1467_v52 = vpop.f32.mrf.mxu0  ;;  %v3476_v55 = vadd.f32 %v1465_v24, %v1262_v8 }
 0x1ed   : > { %v762_v51 = vpop.f32.mrf.mxu1 }
 0x1ee   : > { %v971_v58 = vpop.f32.mrf.mxu2  ;;  %v763_v3 = vadd.f32 %v762_v51, %v3235_v12 }
 0x1ef   : > { %v1015_v59 = vadd.f32 %v971_v58, %v760_v28  ;;  %2839 = vmatmul.msk.bf16.gmra.mxu3 %vm305_vm1, %v2055_v44  ;;  %v1778_v44 = vld [vmem:[#allocation2 + $0x94] sm:$0xff] }
 0x1f0   : > { %2800 = vmatmul.msk.bf16.gmra.mxu1 %vm305_vm1, %v1805_v26  ;;  %v1807_v51 = vpack.c.bf16 %v1779_v61, %v1778_v44  ;;  %v2274_v58 = vld [vmem:[#allocation2 + $0x96] sm:$0xff]  ;;  %v1781_v44 = vld [vmem:[#allocation2 + $0xac] sm:$0xff] }
 0x1f1   : > { %v1263_v62 = vadd.f32 %v1219_v63, %v1015_v59  ;;  %v2056_v63 = vpack.c.bf16 %v2029_v13, %v2028_v43  ;;  %v2275_v59 = vld [vmem:[#allocation2 + $0x9e] sm:$0xff] }
 0x1f2   : > { %v1227_v32 = vpop.f32.mrf.mxu3  ;;  %v2303_v34 = vpack.c.bf16 %v2275_v59, %v2274_v58 }
 0x1f3   : > { %v1470_v46 = vpop.f32.mrf.mxu0  ;;  %2819 = vmatmul.msk.bf16.gmra.mxu2 %vm305_vm1, %v1806_v33  ;;  %v3482_v27 = vadd.f32 %v1467_v52, %v1263_v62 }
 0x1f5   : > { %v764_v24 = vpop.f32.mrf.mxu1 }
 0x1f6   : > { %2857 = vmatmul.msk.bf16.gmra.mxu0 %vm305_vm1, %v2302_v47  ;;  %v974_v11 = vpop.f32.mrf.mxu2  ;;  %v765_v52 = vadd.f32 %v764_v24, %v3245_v20 }
 0x1f7   : > { %v1016_v54 = vadd.f32 %v974_v11, %v763_v3  ;;  %v2030_v11 = vld [vmem:[#allocation2 + $0xb5] sm:$0xff] }
 0x1f9   : > { %v1264_v25 = vadd.f32 %v1222_v15, %v1016_v54  ;;  %v2031_v54 = vld [vmem:[#allocation2 + $0xbd] sm:$0xff] }
 0x1fa   : > { %v1229_v60 = vpop.f32.mrf.mxu3 }
 0x1fb   : > { %v1472_v26 = vpop.f32.mrf.mxu0  ;;  %v3486_v8 = vadd.f32 %v1470_v46, %v1264_v25 }
 0x1fd   : > { %v767_v21 = vpop.f32.mrf.mxu1 }
 0x1fe   : > { %v976_v28 = vpop.f32.mrf.mxu2  ;;  %v768_v20 = vadd.f32 %v767_v21, %v3255_v29 }
 0x1ff   : > { %v1017_v12 = vadd.f32 %v976_v28, %v765_v52  ;;  %2840 = vmatmul.msk.bf16.gmra.mxu3 %vm305_vm1, %v2056_v63  ;;  %v1780_v63 = vld [vmem:[#allocation2 + $0xa4] sm:$0xff] }
 0x200   : > { %2801 = vmatmul.msk.bf16.gmra.mxu1 %vm305_vm1, %v1806_v33  ;;  %v1808_v21 = vpack.c.bf16 %v1781_v44, %v1780_v63  ;;  %v2276_v28 = vld [vmem:[#allocation2 + $0xa6] sm:$0xff] }
 0x201   : > { %v1265_v15 = vadd.f32 %v1224_v50, %v1017_v12  ;;  %v2057_v50 = vpack.c.bf16 %v2031_v54, %v2030_v11  ;;  %v2277_v12 = vld [vmem:[#allocation2 + $0xae] sm:$0xff] }
 0x202   : > { %v2134_v56 = vpop.f32.mrf.mxu3  ;;  %v2304_v58 = vpack.c.bf16 %v2277_v12, %v2276_v28  ;;  %v2279_v28 = vld [vmem:[#allocation2 + $0xbe] sm:$0xff] }
 0x203   : > { %v1475_v62 = vpop.f32.mrf.mxu0  ;;  %2820 = vmatmul.msk.bf16.gmra.mxu2 %vm305_vm1, %v1807_v51  ;;  %v3492_v47 = vadd.f32 %v1472_v26, %v1265_v15 }
 0x205   : > { %v769_v46 = vpop.f32.mrf.mxu1 }
 0x206   : > { %2858 = vmatmul.msk.bf16.gmra.mxu0 %vm305_vm1, %v2303_v34  ;;  %v979_v3 = vpop.f32.mrf.mxu2  ;;  %v770_v26 = vadd.f32 %v769_v46, %v3265_v37 }
 0x207   : > { %v1018_v24 = vadd.f32 %v979_v3, %v768_v20  ;;  %v2032_v3 = vld [vmem:[#allocation2 + $0xc5] sm:$0xff] }
 0x209   : > { %v1266_v43 = vadd.f32 %v1227_v32, %v1018_v24  ;;  %v2033_v24 = vld [vmem:[#allocation2 + $0xcd] sm:$0xff] }
 0x20a   : > { %v2136_v13 = vpop.f32.mrf.mxu3 }
 0x20b   : > { %v1477_v33 = vpop.f32.mrf.mxu0  ;;  %v3496_v25 = vadd.f32 %v1475_v62, %v1266_v43 }
 0x20d   : > { %v1638_v61 = vpop.f32.mrf.mxu1 }
 0x20e   : > { %v981_v52 = vpop.f32.mrf.mxu2  ;;  %v1728_v37 = vadd.f32 %v1638_v61, %v3297_v57  ;;  %v1782_v57 = vld [vmem:[#allocation2 + $0xb4] sm:$0xff] }
 0x20f   : > { %v1019_v29 = vadd.f32 %v981_v52, %v770_v26  ;;  %2841 = vmatmul.msk.bf16.gmra.mxu3 %vm305_vm1, %v2057_v50  ;;  %v1783_v50 = vld [vmem:[#allocation2 + $0xbc] sm:$0xff] }
 0x210   : > { %2802 = vmatmul.msk.bf16.gmra.mxu1 %vm305_vm1, %v1807_v51  ;;  %v1809_v52 = vpack.c.bf16 %v1783_v50, %v1782_v57  ;;  %v1784_v57 = vld [vmem:[#allocation2 + $0xc4] sm:$0xff]  ;;  %v1785_v50 = vld [vmem:[#allocation2 + $0xcc] sm:$0xff] }
 0x211   : > { %v1267_v32 = vadd.f32 %v1229_v60, %v1019_v29  ;;  %v3510_v60 = vld [vmem:[%s3709_s2] ss:$0 sm:$0xff]  ;;  %v2278_v29 = vld [vmem:[#allocation2 + $0xb6] sm:$0xff] }
 0x212   : > { %v2139_v59 = vpop.f32.mrf.mxu3 }
 0x213   : > { %v2382_v15 = vpop.f32.mrf.mxu0  ;;  %2821 = vmatmul.msk.bf16.gmra.mxu2 %vm305_vm1, %v1808_v21  ;;  %v3502_v34 = vadd.f32 %v1477_v33, %v1267_v32  ;;  %v2058_v33 = vpack.c.bf16 %v2033_v24, %v2032_v3  ;;  %v2305_v32 = vpack.c.bf16 %v2279_v28, %v2278_v29  ;;  %v2280_v29 = vld [vmem:[#allocation2 + $0xc6] sm:$0xff]  ;;  %v2281_v28 = vld [vmem:[#allocation2 + $0xce] sm:$0xff] }
 0x215   : > { %v1640_v62 = vpop.f32.mrf.mxu1 }
 0x216   : > { %2859 = vmatmul.msk.bf16.gmra.mxu0 %vm305_vm1, %v2304_v58  ;;  %v1886_v20 = vpop.f32.mrf.mxu2  ;;  %v1729_v63 = vadd.f32 %v1640_v62, %v3304_v19 }
 0x217   : > { %v1976_v46 = vadd.f32 %v1886_v20, %v1728_v37 }
 0x219   : > { %v2224_v11 = vadd.f32 %v2134_v56, %v1976_v46 }
 0x21a   : > { %v2141_v51 = vpop.f32.mrf.mxu3 }
 0x21b   : > { %v2472_v54 = vadd.f32 %v2382_v15, %v2224_v11  ;;  %v2384_v43 = vpop.f32.mrf.mxu0 }
 0x21d   : > { %v2512_v56 = vadd.f32 %v3510_v60, %v2472_v54  ;;  %v1643_v44 = vpop.f32.mrf.mxu1 }
 0x21e   : > { %v1888_v26 = vpop.f32.mrf.mxu2  ;;  %v1730_v62 = vadd.f32 %v1643_v44, %v3310_v22 }
 0x21f   : > { %2549 = vst.msk [vmem:[%s3515_s20] sm:$0xff] %vm2548_vm2, %v2512_v56  ;;  %v1977_v61 = vadd.f32 %v1888_v26, %v1729_v63  ;;  %2842 = vmatmul.msk.bf16.gmra.mxu3 %vm305_vm1, %v2058_v33 }
 0x220   : > { %2803 = vmatmul.msk.bf16.gmra.mxu1 %vm305_vm1, %v1808_v21  ;;  %v2034_v21 = vld [vmem:[#allocation2 + $0xd5] sm:$0xff] }
 0x221   : > { %v2225_v12 = vadd.f32 %v2136_v13, %v1977_v61  ;;  %v2035_v13 = vld [vmem:[#allocation2 + $0xdd] sm:$0xff]  ;;  %v1810_v61 = vpack.c.bf16 %v1785_v50, %v1784_v57 }
 0x222   : > { %v2144_v58 = vpop.f32.mrf.mxu3  ;;  %v2059_v33 = vpack.c.bf16 %v2035_v13, %v2034_v21 }
 0x223   : > { %v2473_v15 = vadd.f32 %v2384_v43, %v2225_v12  ;;  %v2387_v37 = vpop.f32.mrf.mxu0  ;;  %2822 = vmatmul.msk.bf16.gmra.mxu2 %vm305_vm1, %v1809_v52  ;;  %v2306_v12 = vpack.c.bf16 %v2281_v28, %v2280_v29 }
 0x225   : > { %v2513_v19 = vadd.f32 %v3510_v60, %v2473_v15  ;;  %v1645_v20 = vpop.f32.mrf.mxu1 }
 0x226   : > { %2860 = vmatmul.msk.bf16.gmra.mxu0 %vm305_vm1, %v2305_v32  ;;  %v1891_v46 = vpop.f32.mrf.mxu2  ;;  %v1731_v22 = vadd.f32 %v1645_v20, %v3318_v17 }
 0x227   : > { %2550 = vst.msk [vmem:[%s3515_s20 + $0x8] sm:$0xff] %vm2548_vm2, %v2513_v19  ;;  %v1978_v3 = vadd.f32 %v1891_v46, %v1730_v62 }
 0x229   : > { %v2226_v24 = vadd.f32 %v2139_v59, %v1978_v3 }
 0x22a   : > { %v2146_v11 = vpop.f32.mrf.mxu3 }
 0x22b   : > { %v2474_v54 = vadd.f32 %v2387_v37, %v2226_v24  ;;  %v2389_v43 = vpop.f32.mrf.mxu0 }
 0x22d   : > { %v2514_v56 = vadd.f32 %v3510_v60, %v2474_v54  ;;  %v1648_v63 = vpop.f32.mrf.mxu1 }
 0x22e   : > { %v1893_v44 = vpop.f32.mrf.mxu2  ;;  %v1732_v19 = vadd.f32 %v1648_v63, %v3324_v48 }
 0x22f   : > { %2551 = vst.msk [vmem:[%s3515_s20 + $0x10] sm:$0xff] %vm2548_vm2, %v2514_v56  ;;  %v1979_v26 = vadd.f32 %v1893_v44, %v1731_v22  ;;  %2843 = vmatmul.msk.bf16.gmra.mxu3 %vm305_vm1, %v2059_v33  ;;  %v1787_v33 = vld [vmem:[#allocation2 + $0xdc] sm:$0xff] }
 0x230   : > { %2804 = vmatmul.msk.bf16.gmra.mxu1 %vm305_vm1, %v1809_v52  ;;  %v2036_v52 = vld [vmem:[#allocation2 + $0xe5] sm:$0xff]  ;;  %v2282_v44 = vld [vmem:[#allocation2 + $0xd6] sm:$0xff] }
 0x231   : > { %v2227_v59 = vadd.f32 %v2141_v51, %v1979_v26  ;;  %v2037_v51 = vld [vmem:[#allocation2 + $0xed] sm:$0xff]  ;;  %v2283_v26 = vld [vmem:[#allocation2 + $0xde] sm:$0xff] }
 0x232   : > { %v2149_v32 = vpop.f32.mrf.mxu3  ;;  %v2060_v54 = vpack.c.bf16 %v2037_v51, %v2036_v52  ;;  %v2307_v29 = vpack.c.bf16 %v2283_v26, %v2282_v44 }
 0x233   : > { %v2475_v15 = vadd.f32 %v2389_v43, %v2227_v59  ;;  %v2392_v37 = vpop.f32.mrf.mxu0  ;;  %2823 = vmatmul.msk.bf16.gmra.mxu2 %vm305_vm1, %v1810_v61  ;;  %v1786_v43 = vld [vmem:[#allocation2 + $0xd4] sm:$0xff] }
 0x234   : > { %v1811_v63 = vpack.c.bf16 %v1787_v33, %v1786_v43 }
 0x235   : > { %v2515_v17 = vadd.f32 %v3510_v60, %v2475_v15  ;;  %v1650_v62 = vpop.f32.mrf.mxu1 }
 0x236   : > { %2861 = vmatmul.msk.bf16.gmra.mxu0 %vm305_vm1, %v2306_v12  ;;  %v1896_v20 = vpop.f32.mrf.mxu2  ;;  %v1733_v48 = vadd.f32 %v1650_v62, %v3332_v5 }
 0x237   : > { %2552 = vst.msk [vmem:[%s3515_s20 + $0x18] sm:$0xff] %vm2548_vm2, %v2515_v17  ;;  %v1980_v46 = vadd.f32 %v1896_v20, %v1732_v19 }
 0x239   : > { %v2228_v3 = vadd.f32 %v2144_v58, %v1980_v46 }
 0x23a   : > { %v2151_v21 = vpop.f32.mrf.mxu3 }
 0x23b   : > { %v2476_v13 = vadd.f32 %v2392_v37, %v2228_v3  ;;  %v2394_v24 = vpop.f32.mrf.mxu0  ;;  %v1788_v3 = vld [vmem:[#allocation2 + $0xe4] sm:$0xff] }
 0x23d   : > { %v2516_v57 = vadd.f32 %v3510_v60, %v2476_v13  ;;  %v1653_v50 = vpop.f32.mrf.mxu1  ;;  %v1789_v13 = vld [vmem:[#allocation2 + $0xec] sm:$0xff] }
 0x23e   : > { %v1898_v56 = vpop.f32.mrf.mxu2  ;;  %v1734_v15 = vadd.f32 %v1653_v50, %v3338_v41  ;;  %v2285_v50 = vld [vmem:[#allocation2 + $0xee] sm:$0xff] }
 0x23f   : > { %2553 = vst.msk [vmem:[%s3515_s20 + $0x20] sm:$0xff] %vm2548_vm2, %v2516_v57  ;;  %v1981_v22 = vadd.f32 %v1898_v56, %v1733_v48  ;;  %2844 = vmatmul.msk.bf16.gmra.mxu3 %vm305_vm1, %v2060_v54  ;;  %v1812_v57 = vpack.c.bf16 %v1789_v13, %v1788_v3  ;;  %v2284_v48 = vld [vmem:[#allocation2 + $0xe6] sm:$0xff]  ;;  %v2286_v13 = vld [vmem:[#allocation2 + $0xf6] sm:$0xff] }
 0x240   : > { %2805 = vmatmul.msk.bf16.gmra.mxu1 %vm305_vm1, %v1810_v61  ;;  %v2038_v61 = vld [vmem:[#allocation2 + $0xf5] sm:$0xff]  ;;  %v2308_v56 = vpack.c.bf16 %v2285_v50, %v2284_v48 }
 0x241   : > { %v2229_v58 = vadd.f32 %v2146_v11, %v1981_v22  ;;  %v2039_v11 = vld [vmem:[#allocation2 + $0xfd] sm:$0xff] }
 0x242   : > { %v2154_v28 = vpop.f32.mrf.mxu3  ;;  %v2061_v51 = vpack.c.bf16 %v2039_v11, %v2038_v61  ;;  %v1790_v61 = vld [vmem:[#allocation2 + $0xf4] sm:$0xff]  ;;  %v1791_v11 = vld [vmem:[#allocation2 + $0xfc] sm:$0xff] }
 0x243   : > { %v2477_v59 = vadd.f32 %v2394_v24, %v2229_v58  ;;  %v2397_v12 = vpop.f32.mrf.mxu0  ;;  %2824 = vmatmul.msk.bf16.gmra.mxu2 %vm305_vm1, %v1811_v63  ;;  %v1813_v3 = vpack.c.bf16 %v1791_v11, %v1790_v61  ;;  %v263_v11 = vld [vmem:[%s3085_s27 + $0xa0] sm:$0x7] }
 0x245   : > { %v2517_v5 = vadd.f32 %v3510_v60, %v2477_v59  ;;  %v1655_v37 = vpop.f32.mrf.mxu1 }
 0x246   : > { %2862 = vmatmul.msk.bf16.gmra.mxu0 %vm305_vm1, %v2307_v29  ;;  %v1901_v17 = vpop.f32.mrf.mxu2  ;;  %v1735_v41 = vadd.f32 %v1655_v37, %v3346_v10 }
 0x247   : > { %2554 = vst.msk [vmem:[%s3515_s20 + $0x28] sm:$0xff] %vm2548_vm2, %v2517_v5  ;;  %v1982_v19 = vadd.f32 %v1901_v17, %v1734_v15 }
 0x249   : > { %v2230_v62 = vadd.f32 %v2149_v32, %v1982_v19 }
 0x24a   : > { %v2156_v20 = vpop.f32.mrf.mxu3 }
 0x24b   : > { %v2478_v46 = vadd.f32 %v2397_v12, %v2230_v62  ;;  %v2399_v52 = vpop.f32.mrf.mxu0 }
 0x24d   : > { %v2518_v24 = vadd.f32 %v3510_v60, %v2478_v46  ;;  %v1658_v54 = vpop.f32.mrf.mxu1 }
 0x24e   : > { %v1903_v43 = vpop.f32.mrf.mxu2  ;;  %v1736_v58 = vadd.f32 %v1658_v54, %v3352_v36 }
 0x24f   : > { %2555 = vst.msk [vmem:[%s3515_s20 + $0x30] sm:$0xff] %vm2548_vm2, %v2518_v24  ;;  %v1983_v33 = vadd.f32 %v1903_v43, %v1735_v41  ;;  %2845 = vmatmul.msk.bf16.gmra.mxu3 %vm305_vm1, %v2061_v51  ;;  %v2287_v24 = vld [vmem:[#allocation2 + $0xfe] sm:$0xff] }
 0x250   : > { %2806 = vmatmul.msk.bf16.gmra.mxu1 %vm305_vm1, %v1811_v63  ;;  %v2040_v63 = vld [vmem:[#allocation2 + $0x105] sm:$0xff]  ;;  %v2309_v41 = vpack.c.bf16 %v2287_v24, %v2286_v13 }
 0x251   : > { %v2231_v32 = vadd.f32 %v2151_v21, %v1983_v33  ;;  %v2041_v21 = vld [vmem:[#allocation2 + $0x10d] sm:$0xff] }
 0x252   : > { %v2159_v22 = vpop.f32.mrf.mxu3  ;;  %v2062_v19 = vpack.c.bf16 %v2041_v21, %v2040_v63 }
 0x253   : > { %v2479_v44 = vadd.f32 %v2399_v52, %v2231_v32  ;;  %v2402_v26 = vpop.f32.mrf.mxu0  ;;  %2825 = vmatmul.msk.bf16.gmra.mxu2 %vm305_vm1, %v1812_v57 }
 0x255   : > { %v2519_v10 = vadd.f32 %v3510_v60, %v2479_v44  ;;  %v1660_v29 = vpop.f32.mrf.mxu1 }
 0x256   : > { %2863 = vmatmul.msk.bf16.gmra.mxu0 %vm305_vm1, %v2308_v56  ;;  %v1906_v59 = vpop.f32.mrf.mxu2  ;;  %v1737_v36 = vadd.f32 %v1660_v29, %v3360_v9 }
 0x257   : > { %2556 = vst.msk [vmem:[%s3515_s20 + $0x38] sm:$0xff] %vm2548_vm2, %v2519_v10  ;;  %v1984_v12 = vadd.f32 %v1906_v59, %v1736_v58  ;;  %v1792_v59 = vld [vmem:[#allocation2 + $0x104] sm:$0xff] }
 0x259   : > { %v2232_v5 = vadd.f32 %v2154_v28, %v1984_v12  ;;  %v1793_v12 = vld [vmem:[#allocation2 + $0x10c] sm:$0xff] }
 0x25a   : > { %v2161_v15 = vpop.f32.mrf.mxu3 }
 0x25b   : > { %v2480_v37 = vadd.f32 %v2402_v26, %v2232_v5  ;;  %v2404_v17 = vpop.f32.mrf.mxu0 }
 0x25d   : > { %v2520_v62 = vadd.f32 %v3510_v60, %v2480_v37  ;;  %v1663_v46 = vpop.f32.mrf.mxu1 }
 0x25e   : > { %v1908_v52 = vpop.f32.mrf.mxu2  ;;  %v1738_v48 = vadd.f32 %v1663_v46, %v3366_v39  ;;  %v3000_v46 = vld [vmem:[%s3085_s27 + $0x98] sm:$0xff]  }
 0x25f   : > { %2557 = vst.msk [vmem:[%s3515_s20 + $0x40] sm:$0xff] %vm2548_vm2, %v2520_v62  ;;  %v1985_v51 = vadd.f32 %v1908_v52, %v1737_v36  ;;  %2846 = vmatmul.msk.bf16.gmra.mxu3 %vm305_vm1, %v2062_v19  ;;  %v2288_v19 = vld [vmem:[#allocation2 + $0x106] sm:$0xff]  ;;  %v2950_v52 = vunpack.c.h.bf16 %v3000_v46 }
 0x260   : > { %2807 = vmatmul.msk.bf16.gmra.mxu1 %vm305_vm1, %v1812_v57  ;;  %v2042_v57 = vld [vmem:[#allocation2 + $0x115] sm:$0xff] }
 0x261   : > { %v2233_v28 = vadd.f32 %v2156_v20, %v1985_v51  ;;  %v2043_v20 = vld [vmem:[#allocation2 + $0x11d] sm:$0xff]  ;;  %345 = vst.msk [vmem:[#allocation2 + $0x138] sm:$0xff] %vm305_vm1, %v2950_v52 }
 0x262   : > { %v2164_v54 = vpop.f32.mrf.mxu3  ;;  %v2063_v29 = vpack.c.bf16 %v2043_v20, %v2042_v57  ;;  %v1794_v57 = vld [vmem:[#allocation2 + $0x114] sm:$0xff]  ;;  %v1795_v20 = vld [vmem:[#allocation2 + $0x11c] sm:$0xff] }
 0x263   : > { %v2481_v43 = vadd.f32 %v2404_v17, %v2233_v28  ;;  %v2407_v33 = vpop.f32.mrf.mxu0  ;;  %2826 = vmatmul.msk.bf16.gmra.mxu2 %vm305_vm1, %v1813_v3  ;;  %v1814_v17 = vpack.c.bf16 %v1793_v12, %v1792_v59  ;;  %v1815_v59 = vpack.c.bf16 %v1795_v20, %v1794_v57  ;;  %v2290_v12 = vld [vmem:[#allocation2 + $0x116] sm:$0xff] }
 0x265   : > { %v2521_v9 = vadd.f32 %v3510_v60, %v2481_v43  ;;  %v1665_v50 = vpop.f32.mrf.mxu1  ;;  %v2044_v43 = vld [vmem:[#allocation2 + $0x125] sm:$0xff] }
 0x266   : > { %2864 = vmatmul.msk.bf16.gmra.mxu0 %vm305_vm1, %v2309_v41  ;;  %v1911_v32 = vpop.f32.mrf.mxu2  ;;  %v1739_v63 = vadd.f32 %v1665_v50, %v3375_v45  ;;  %v304_v45 = vunpack.c.l.bf16 %v263_v11 }
 0x267   : > { %2558 = vst.msk [vmem:[%s3515_s20 + $0x48] sm:$0xff] %vm2548_vm2, %v2521_v9  ;;  %v1986_v56 = vadd.f32 %v1911_v32, %v1738_v48 }
 0x268   : > { %347 = vst.msk [vmem:[#allocation2 + $0x140] sm:$0x3f] %vm346_vm3, %v304_v45 }
 0x269   : > { %v2234_v44 = vadd.f32 %v2159_v22, %v1986_v56  ;;  %v2289_v22 = vld [vmem:[#allocation2 + $0x10e] sm:$0xff] }
 0x26a   : > { %v2166_v26 = vpop.f32.mrf.mxu3  ;;  %v2310_v62 = vpack.c.bf16 %v2289_v22, %v2288_v19 }
 0x26b   : > { %v2482_v10 = vadd.f32 %v2407_v33, %v2234_v44  ;;  %v2409_v58 = vpop.f32.mrf.mxu0  ;;  %v2045_v33 = vld [vmem:[#allocation2 + $0x12d] sm:$0xff] }
 0x26c   : > { %v2064_v56 = vpack.c.bf16 %v2045_v33, %v2044_v43  ;;  %v2292_v33 = vld [vmem:[#allocation2 + $0x126] sm:$0xff] }
 0x26d   : > { %v2522_v39 = vadd.f32 %v3510_v60, %v2482_v10  ;;  %v1668_v21 = vpop.f32.mrf.mxu1 }
 0x26e   : > { %v1913_v5 = vpop.f32.mrf.mxu2  ;;  %v1740_v28 = vadd.f32 %v1668_v21, %v3382_v6 }
 0x26f   : > { %2559 = vst.msk [vmem:[%s3515_s20 + $0x50] sm:$0xff] %vm2548_vm2, %v2522_v39  ;;  %v1987_v37 = vadd.f32 %v1913_v5, %v1739_v63  ;;  %2847 = vmatmul.msk.bf16.gmra.mxu3 %vm305_vm1, %v2063_v29  ;;  %v2291_v39 = vld [vmem:[#allocation2 + $0x11e] sm:$0xff] }
 0x270   : > { %2808 = vmatmul.msk.bf16.gmra.mxu1 %vm305_vm1, %v1813_v3  ;;  %v2311_v63 = vpack.c.bf16 %v2291_v39, %v2290_v12  ;;  %v1798_v12 = vld [vmem:[#allocation2 + $0x134] sm:$0xff]  ;;  %v1799_v39 = vld [vmem:[#allocation2 + $0x13c] sm:$0xff] }
 0x271   : > { %v2235_v61 = vadd.f32 %v2161_v15, %v1987_v37 }
 0x272   : > { %v2169_v36 = vpop.f32.mrf.mxu3 }
 0x273   : > { %v2483_v51 = vadd.f32 %v2409_v58, %v2235_v61  ;;  %v2412_v13 = vpop.f32.mrf.mxu0  ;;  %2827 = vmatmul.msk.bf16.gmra.mxu2 %vm305_vm1, %v1814_v17 }
 0x275   : > { %v2523_v24 = vadd.f32 %v3510_v60, %v2483_v51  ;;  %v1670_v3 = vpop.f32.mrf.mxu1 }
 0x276   : > { %2865 = vmatmul.msk.bf16.gmra.mxu0 %vm305_vm1, %v2310_v62  ;;  %v1916_v15 = vpop.f32.mrf.mxu2  ;;  %v1741_v44 = vadd.f32 %v1670_v3, %v3390_v0 }
 0x277   : > { %2560 = vst.msk [vmem:[%s3515_s20 + $0x58] sm:$0xff] %vm2548_vm2, %v2523_v24  ;;  %v1988_v41 = vadd.f32 %v1916_v15, %v1740_v28  ;;  %v1797_v24 = vld [vmem:[#allocation2 + $0x12c] sm:$0xff] }
 0x279   : > { %v2236_v9 = vadd.f32 %v2164_v54, %v1988_v41 }
 0x27a   : > { %v2171_v48 = vpop.f32.mrf.mxu3 }
 0x27b   : > { %v2484_v50 = vadd.f32 %v2412_v13, %v2236_v9  ;;  %v2414_v32 = vpop.f32.mrf.mxu0  ;;  %v1796_v13 = vld [vmem:[#allocation2 + $0x124] sm:$0xff]  ;;  %v2293_v9 = vld [vmem:[#allocation2 + $0x12e] sm:$0xff] }
 0x27c   : > { %v1816_v43 = vpack.c.bf16 %v1797_v24, %v1796_v13 }
 0x27d   : > { %v2524_v6 = vadd.f32 %v3510_v60, %v2484_v50  ;;  %v1673_v10 = vpop.f32.mrf.mxu1  ;;  %v2312_v50 = vpack.c.bf16 %v2293_v9, %v2292_v33 }
 0x27e   : > { %v1918_v58 = vpop.f32.mrf.mxu2  ;;  %v1742_v19 = vadd.f32 %v1673_v10, %v3394_v30 }
 0x27f   : > { %2561 = vst.msk [vmem:[%s3515_s20 + $0x60] sm:$0xff] %vm2548_vm2, %v2524_v6  ;;  %v1989_v29 = vadd.f32 %v1918_v58, %v1741_v44  ;;  %2848 = vmatmul.msk.bf16.gmra.mxu3 %vm305_vm1, %v2064_v56 }
 0x280   : > { %2809 = vmatmul.msk.bf16.gmra.mxu1 %vm305_vm1, %v1814_v17  ;;  %v2046_v17 = vld [vmem:[#allocation2 + $0x135] sm:$0xff] }
 0x281   : > { %v2237_v54 = vadd.f32 %v2166_v26, %v1989_v29  ;;  %v2047_v26 = vld [vmem:[#allocation2 + $0x13d] sm:$0xff] }
 0x282   : > { %v2174_v21 = vpop.f32.mrf.mxu3  ;;  %v2065_v51 = vpack.c.bf16 %v2047_v26, %v2046_v17 }
 0x283   : > { %v2485_v5 = vadd.f32 %v2414_v32, %v2237_v54  ;;  %v2417_v37 = vpop.f32.mrf.mxu0  ;;  %2828 = vmatmul.msk.bf16.gmra.mxu2 %vm305_vm1, %v1815_v59 }
 0x285   : > { %v2525_v0 = vadd.f32 %v3510_v60, %v2485_v5  ;;  %v1675_v22 = vpop.f32.mrf.mxu1 }
 0x286   : > { %2866 = vmatmul.msk.bf16.gmra.mxu0 %vm305_vm1, %v2311_v63  ;;  %v1921_v61 = vpop.f32.mrf.mxu2  ;;  %v1743_v30 = vadd.f32 %v1675_v22, %v3401_v2  ;;  %v2295_v22 = vld [vmem:[#allocation2 + $0x13e] sm:$0xff] }
 0x287   : > { %2562 = vst.msk [vmem:[%s3515_s20 + $0x68] sm:$0xff] %vm2548_vm2, %v2525_v0  ;;  %v1990_v11 = vadd.f32 %v1921_v61, %v1742_v19  ;;  %v1817_v0 = vpack.c.bf16 %v1799_v39, %v1798_v12  ;;  %v2294_v19 = vld [vmem:[#allocation2 + $0x136] sm:$0xff] }
 0x288   : > { %v2313_v61 = vpack.c.bf16 %v2295_v22, %v2294_v19 }
 0x289   : > { %v2238_v62 = vadd.f32 %v2169_v36, %v1990_v11 }
 0x28a   : > { %v2176_v46 = vpop.f32.mrf.mxu3 }
 0x28b   : > { %v2486_v52 = vadd.f32 %v2417_v37, %v2238_v62  ;;  %v2419_v45 = vpop.f32.mrf.mxu0 }
 0x28d   : > { %v2526_v28 = vadd.f32 %v3510_v60, %v2486_v52  ;;  %v1678_v3 = vpop.f32.mrf.mxu1 }
 0x28e   : > { %v1923_v15 = vpop.f32.mrf.mxu2  ;;  %v1744_v20 = vadd.f32 %v1678_v3, %v3405_v49 }
 0x28f   : > { %2563 = vst.msk [vmem:[%s3515_s20 + $0x70] sm:$0xff] %vm2548_vm2, %v2526_v28  ;;  %v1991_v41 = vadd.f32 %v1923_v15, %v1743_v30  ;;  %2849 = vmatmul.msk.bf16.gmra.mxu3 %vm305_vm1, %v2065_v51 }
 0x290   : > { %2810 = vmatmul.msk.bf16.gmra.mxu1 %vm305_vm1, %v1815_v59 }
 0x291   : > { %v2239_v36 = vadd.f32 %v2171_v48, %v1991_v41 }
 0x292   : > { %v2179_v32 = vpop.f32.mrf.mxu3 }
 0x293   : > { %v2487_v56 = vadd.f32 %v2419_v45, %v2239_v36  ;;  %v2422_v57 = vpop.f32.mrf.mxu0  ;;  %2829 = vmatmul.msk.bf16.gmra.mxu2 %vm305_vm1, %v1816_v43 }
 0x295   : > { %v2527_v2 = vadd.f32 %v3510_v60, %v2487_v56  ;;  %v1680_v6 = vpop.f32.mrf.mxu1 }
 0x296   : > { %2867 = vmatmul.msk.bf16.gmra.mxu0 %vm305_vm1, %v2312_v50  ;;  %v1926_v44 = vpop.f32.mrf.mxu2  ;;  %v1745_v63 = vadd.f32 %v1680_v6, %v3412_v16 }
 0x297   : > { %2564 = vst.msk [vmem:[%s3515_s20 + $0x78] sm:$0xff] %vm2548_vm2, %v2527_v2  ;;  %v1992_v10 = vadd.f32 %v1926_v44, %v1744_v20 }
 0x299   : > { %v2240_v58 = vadd.f32 %v2174_v21, %v1992_v10 }
 0x29a   : > { %v2181_v48 = vpop.f32.mrf.mxu3 }
 0x29b   : > { %v2488_v29 = vadd.f32 %v2422_v57, %v2240_v58  ;;  %v2424_v59 = vpop.f32.mrf.mxu0 }
 0x29d   : > { %v2528_v54 = vadd.f32 %v3510_v60, %v2488_v29  ;;  %v1683_v5 = vpop.f32.mrf.mxu1 }
 0x29e   : > { %v1928_v49 = vpop.f32.mrf.mxu2  ;;  %v1746_v62 = vadd.f32 %v1683_v5, %v3416_v35 }
 0x29f   : > { %2565 = vst.msk [vmem:[%s3515_s20 + $0x80] sm:$0xff] %vm2548_vm2, %v2528_v54  ;;  %v1993_v37 = vadd.f32 %v1928_v49, %v1745_v63 }
 0x2a0   : > { %2811 = vmatmul.msk.bf16.gmra.mxu1 %vm305_vm1, %v1816_v43 }
 0x2a1   : > { %v2241_v21 = vadd.f32 %v2176_v46, %v1993_v37 }
 0x2a2   : > { %v2184_v11 = vpop.f32.mrf.mxu3 }
 0x2a3   : > { %v2489_v17 = vadd.f32 %v2424_v59, %v2241_v21  ;;  %v2427_v26 = vpop.f32.mrf.mxu0  ;;  %2830 = vmatmul.msk.bf16.gmra.mxu2 %vm305_vm1, %v1817_v0 }
 0x2a5   : > { %v2529_v16 = vadd.f32 %v3510_v60, %v2489_v17  ;;  %v1685_v52 = vpop.f32.mrf.mxu1 }
 0x2a6   : > { %2868 = vmatmul.msk.bf16.gmra.mxu0 %vm305_vm1, %v2313_v61  ;;  %v1931_v45 = vpop.f32.mrf.mxu2  ;;  %v1747_v3 = vadd.f32 %v1685_v52, %v3422_v31 }
 0x2a7   : > { %2566 = vst.msk [vmem:[%s3515_s20 + $0x88] sm:$0xff] %vm2548_vm2, %v2529_v16  ;;  %v1994_v51 = vadd.f32 %v1931_v45, %v1746_v62 }
 0x2a9   : > { %v2242_v13 = vadd.f32 %v2179_v32, %v1994_v51 }
 0x2aa   : > { %v2186_v46 = vpop.f32.mrf.mxu3 }
 0x2ab   : > { %v2490_v24 = vadd.f32 %v2427_v26, %v2242_v13  ;;  %v2429_v28 = vpop.f32.mrf.mxu0 }
 0x2ad   : > { %v2530_v30 = vadd.f32 %v3510_v60, %v2490_v24  ;;  %v1688_v15 = vpop.f32.mrf.mxu1 }
 0x2ae   : > { %v1933_v41 = vpop.f32.mrf.mxu2  ;;  %v1748_v32 = vadd.f32 %v1688_v15, %v3426_v1 }
 0x2af   : > { %2567 = vst.msk [vmem:[%s3515_s20 + $0x90] sm:$0xff] %vm2548_vm2, %v2530_v30  ;;  %v1995_v35 = vadd.f32 %v1933_v41, %v1747_v3 }
 0x2b1   : > { %v2243_v43 = vadd.f32 %v2181_v48, %v1995_v35 }
 0x2b2   : > { %v2189_v33 = vpop.f32.mrf.mxu3 }
 0x2b3   : > { %v2491_v9 = vadd.f32 %v2429_v28, %v2243_v43  ;;  %v2432_v36 = vpop.f32.mrf.mxu0 }
 0x2b5   : > { %v2531_v50 = vadd.f32 %v3510_v60, %v2491_v9  ;;  %v1690_v56 = vpop.f32.mrf.mxu1 }
 0x2b6   : > { %v1936_v57 = vpop.f32.mrf.mxu2  ;;  %v1749_v58 = vadd.f32 %v1690_v56, %v3432_v18 }
 0x2b7   : > { %2568 = vst.msk [vmem:[%s3515_s20 + $0x98] sm:$0xff] %vm2548_vm2, %v2531_v50  ;;  %v1996_v2 = vadd.f32 %v1936_v57, %v1748_v32 }
 0x2b9   : > { %v2244_v31 = vadd.f32 %v2184_v11, %v1996_v2 }
 0x2ba   : > { %v2191_v20 = vpop.f32.mrf.mxu3 }
 0x2bb   : > { %v2492_v6 = vadd.f32 %v2432_v36, %v2244_v31  ;;  %v2434_v44 = vpop.f32.mrf.mxu0 }
 0x2bd   : > { %v2532_v10 = vadd.f32 %v3510_v60, %v2492_v6  ;;  %v1693_v48 = vpop.f32.mrf.mxu1 }
 0x2be   : > { %v1938_v29 = vpop.f32.mrf.mxu2  ;;  %v1750_v5 = vadd.f32 %v1693_v48, %v3436_v4 }
 0x2bf   : > { %2569 = vst.msk [vmem:[%s3515_s20 + $0xa0] sm:$0xff] %vm2548_vm2, %v2532_v10  ;;  %v1997_v59 = vadd.f32 %v1938_v29, %v1749_v58 }
 0x2c1   : > { %v2245_v1 = vadd.f32 %v2186_v46, %v1997_v59 }
 0x2c2   : > { %v2194_v12 = vpop.f32.mrf.mxu3 }
 0x2c3   : > { %v2493_v39 = vadd.f32 %v2434_v44, %v2245_v1  ;;  %v2437_v54 = vpop.f32.mrf.mxu0 }
 0x2c5   : > { %v2533_v63 = vadd.f32 %v3510_v60, %v2493_v39  ;;  %v1695_v49 = vpop.f32.mrf.mxu1 }
 0x2c6   : > { %v1941_v37 = vpop.f32.mrf.mxu2  ;;  %v1751_v11 = vadd.f32 %v1695_v49, %v3442_v7 }
 0x2c7   : > { %2570 = vst.msk [vmem:[%s3515_s20 + $0xa8] sm:$0xff] %vm2548_vm2, %v2533_v63  ;;  %v1998_v0 = vadd.f32 %v1941_v37, %v1750_v5 }
 0x2c9   : > { %v2246_v18 = vadd.f32 %v2189_v33, %v1998_v0 }
 0x2ca   : > { %v2196_v21 = vpop.f32.mrf.mxu3 }
 0x2cb   : > { %v2494_v19 = vadd.f32 %v2437_v54, %v2246_v18  ;;  %v2439_v22 = vpop.f32.mrf.mxu0 }
 0x2cd   : > { %v2534_v61 = vadd.f32 %v3510_v60, %v2494_v19  ;;  %v1698_v17 = vpop.f32.mrf.mxu1 }
 0x2ce   : > { %v1943_v26 = vpop.f32.mrf.mxu2  ;;  %v1752_v51 = vadd.f32 %v1698_v17, %v3446_v38 }
 0x2cf   : > { %2571 = vst.msk [vmem:[%s3515_s20 + $0xb0] sm:$0xff] %vm2548_vm2, %v2534_v61  ;;  %v1999_v16 = vadd.f32 %v1943_v26, %v1751_v11 }
 0x2d1   : > { %v2247_v4 = vadd.f32 %v2191_v20, %v1999_v16 }
 0x2d2   : > { %v2199_v24 = vpop.f32.mrf.mxu3 }
 0x2d3   : > { %v2495_v62 = vadd.f32 %v2439_v22, %v2247_v4  ;;  %v2442_v52 = vpop.f32.mrf.mxu0 }
 0x2d5   : > { %v2535_v45 = vadd.f32 %v3510_v60, %v2495_v62  ;;  %v1700_v13 = vpop.f32.mrf.mxu1 }
 0x2d6   : > { %v1946_v46 = vpop.f32.mrf.mxu2  ;;  %v1753_v41 = vadd.f32 %v1700_v13, %v3452_v40 }
 0x2d7   : > { %2572 = vst.msk [vmem:[%s3515_s20 + $0xb8] sm:$0xff] %vm2548_vm2, %v2535_v45  ;;  %v2000_v28 = vadd.f32 %v1946_v46, %v1752_v51 }
 0x2d9   : > { %v2248_v7 = vadd.f32 %v2194_v12, %v2000_v28 }
 0x2da   : > { %v2201_v38 = vpop.f32.mrf.mxu3 }
 0x2db   : > { %v2496_v30 = vadd.f32 %v2442_v52, %v2248_v7  ;;  %v2444_v3 = vpop.f32.mrf.mxu0 }
 0x2dd   : > { %v2536_v15 = vadd.f32 %v3510_v60, %v2496_v30  ;;  %v1703_v35 = vpop.f32.mrf.mxu1 }
 0x2de   : > { %v1948_v43 = vpop.f32.mrf.mxu2  ;;  %v1754_v56 = vadd.f32 %v1703_v35, %v3456_v14 }
 0x2df   : > { %2573 = vst.msk [vmem:[%s3515_s20 + $0xc0] sm:$0xff] %vm2548_vm2, %v2536_v15  ;;  %v2001_v33 = vadd.f32 %v1948_v43, %v1753_v41 }
 0x2e1   : > { %v2249_v9 = vadd.f32 %v2196_v21, %v2001_v33 }
 0x2e2   : > { %v2204_v20 = vpop.f32.mrf.mxu3 }
 0x2e3   : > { %v2497_v36 = vadd.f32 %v2444_v3, %v2249_v9  ;;  %v2447_v50 = vpop.f32.mrf.mxu0 }
 0x2e5   : > { %v2537_v32 = vadd.f32 %v3510_v60, %v2497_v36  ;;  %v1705_v57 = vpop.f32.mrf.mxu1 }
 0x2e6   : > { %v1951_v2 = vpop.f32.mrf.mxu2  ;;  %v1755_v58 = vadd.f32 %v1705_v57, %v3462_v42 }
 0x2e7   : > { %2574 = vst.msk [vmem:[%s3515_s20 + $0xc8] sm:$0xff] %vm2548_vm2, %v2537_v32  ;;  %v2002_v31 = vadd.f32 %v1951_v2, %v1754_v56 }
 0x2e9   : > { %v2250_v40 = vadd.f32 %v2199_v24, %v2002_v31 }
 0x2ea   : > { %v2206_v39 = vpop.f32.mrf.mxu3 }
 0x2eb   : > { %v2498_v6 = vadd.f32 %v2447_v50, %v2250_v40  ;;  %v2449_v44 = vpop.f32.mrf.mxu0 }
 0x2ed   : > { %v2538_v10 = vadd.f32 %v3510_v60, %v2498_v6  ;;  %v1708_v48 = vpop.f32.mrf.mxu1 }
 0x2ee   : > { %v1953_v29 = vpop.f32.mrf.mxu2  ;;  %v1756_v63 = vadd.f32 %v1708_v48, %v3466_v53 }
 0x2ef   : > { %2575 = vst.msk [vmem:[%s3515_s20 + $0xd0] sm:$0xff] %vm2548_vm2, %v2538_v10  ;;  %v2003_v59 = vadd.f32 %v1953_v29, %v1755_v58 }
 0x2f1   : > { %v2251_v14 = vadd.f32 %v2201_v38, %v2003_v59 }
 0x2f2   : > { %v2209_v11 = vpop.f32.mrf.mxu3 }
 0x2f3   : > { %v2499_v1 = vadd.f32 %v2449_v44, %v2251_v14  ;;  %v2452_v12 = vpop.f32.mrf.mxu0 }
 0x2f5   : > { %v2539_v54 = vadd.f32 %v3510_v60, %v2499_v1  ;;  %v1710_v5 = vpop.f32.mrf.mxu1 }
 0x2f6   : > { %v1956_v49 = vpop.f32.mrf.mxu2  ;;  %v1757_v22 = vadd.f32 %v1710_v5, %v3472_v23 }
 0x2f7   : > { %2576 = vst.msk [vmem:[%s3515_s20 + $0xd8] sm:$0xff] %vm2548_vm2, %v2539_v54  ;;  %v2004_v37 = vadd.f32 %v1956_v49, %v1756_v63 }
 0x2f9   : > { %v2252_v42 = vadd.f32 %v2204_v20, %v2004_v37 }
 0x2fa   : > { %v2211_v23 = vpop.f32.mrf.mxu3 }
 0x2fb   : > { %v2500_v0 = vadd.f32 %v2452_v12, %v2252_v42  ;;  %v2454_v18 = vpop.f32.mrf.mxu0 }
 0x2fd   : > { %v2540_v19 = vadd.f32 %v3510_v60, %v2500_v0  ;;  %v1713_v21 = vpop.f32.mrf.mxu1 }
 0x2fe   : > { %v1958_v61 = vpop.f32.mrf.mxu2  ;;  %v1758_v62 = vadd.f32 %v1713_v21, %v3476_v55 }
 0x2ff   : > { %2577 = vst.msk [vmem:[%s3515_s20 + $0xe0] sm:$0xff] %vm2548_vm2, %v2540_v19  ;;  %v2005_v17 = vadd.f32 %v1958_v61, %v1757_v22 }
 0x301   : > { %v2253_v53 = vadd.f32 %v2206_v39, %v2005_v17 }
 0x302   : > { %v2214_v41 = vpop.f32.mrf.mxu3 }
 0x303   : > { %v2501_v26 = vadd.f32 %v2454_v18, %v2253_v53  ;;  %v2457_v16 = vpop.f32.mrf.mxu0 }
 0x305   : > { %v2541_v4 = vadd.f32 %v3510_v60, %v2501_v26  ;;  %v1715_v52 = vpop.f32.mrf.mxu1 }
 0x306   : > { %v1961_v45 = vpop.f32.mrf.mxu2  ;;  %v1759_v7 = vadd.f32 %v1715_v52, %v3482_v27 }
 0x307   : > { %2578 = vst.msk [vmem:[%s3515_s20 + $0xe8] sm:$0xff] %vm2548_vm2, %v2541_v4  ;;  %v2006_v51 = vadd.f32 %v1961_v45, %v1758_v62 }
 0x309   : > { %v2254_v13 = vadd.f32 %v2209_v11, %v2006_v51 }
 0x30a   : > { %v2216_v56 = vpop.f32.mrf.mxu3 }
 0x30b   : > { %v2502_v46 = vadd.f32 %v2457_v16, %v2254_v13  ;;  %v2459_v24 = vpop.f32.mrf.mxu0 }
 0x30d   : > { %v2542_v28 = vadd.f32 %v3510_v60, %v2502_v46  ;;  %v1718_v30 = vpop.f32.mrf.mxu1 }
 0x30e   : > { %v1963_v3 = vpop.f32.mrf.mxu2  ;;  %v1760_v38 = vadd.f32 %v1718_v30, %v3486_v8 }
 0x30f   : > { %2579 = vst.msk [vmem:[%s3515_s20 + $0xf0] sm:$0xff] %vm2548_vm2, %v2542_v28  ;;  %v2007_v15 = vadd.f32 %v1963_v3, %v1759_v7 }
 0x311   : > { %v2255_v55 = vadd.f32 %v2211_v23, %v2007_v15 }
 0x312   : > { %v2219_v48 = vpop.f32.mrf.mxu3 }
 0x313   : > { %v2503_v35 = vadd.f32 %v2459_v24, %v2255_v55  ;;  %v2462_v43 = vpop.f32.mrf.mxu0 }
 0x315   : > { %v2543_v33 = vadd.f32 %v3510_v60, %v2503_v35  ;;  %v1720_v36 = vpop.f32.mrf.mxu1 }
 0x316   : > { %v1966_v9 = vpop.f32.mrf.mxu2  ;;  %v1761_v2 = vadd.f32 %v1720_v36, %v3492_v47 }
 0x317   : > { %2580 = vst.msk [vmem:[%s3515_s20 + $0xf8] sm:$0xff] %vm2548_vm2, %v2543_v33  ;;  %v2008_v50 = vadd.f32 %v1966_v9, %v1760_v38 }
 0x319   : > { %v2256_v27 = vadd.f32 %v2214_v41, %v2008_v50 }
 0x31a   : > { %v2221_v49 = vpop.f32.mrf.mxu3 }
 0x31b   : > { %v2504_v32 = vadd.f32 %v2462_v43, %v2256_v27  ;;  %v2464_v31 = vpop.f32.mrf.mxu0 }
 0x31d   : > { %v2544_v57 = vadd.f32 %v3510_v60, %v2504_v32  ;;  %v1723_v6 = vpop.f32.mrf.mxu1 }
 0x31e   : > { %v1968_v40 = vpop.f32.mrf.mxu2  ;;  %v1762_v58 = vadd.f32 %v1723_v6, %v3496_v25 }
 0x31f   : > { %2581 = vst.msk [vmem:[%s3515_s20 + $0x100] sm:$0xff] %vm2548_vm2, %v2544_v57  ;;  %v2009_v20 = vadd.f32 %v1968_v40, %v1761_v2 }
 0x321   : > { %v2257_v8 = vadd.f32 %v2216_v56, %v2009_v20 }
 0x323   : > { %v2505_v44 = vadd.f32 %v2464_v31, %v2257_v8  ;;  %v2467_v47 = vpop.f32.mrf.mxu0 }
 0x325   : > { %v2545_v10 = vadd.f32 %v3510_v60, %v2505_v44  ;;  %v1725_v1 = vpop.f32.mrf.mxu1 }
 0x326   : > { %v1971_v29 = vpop.f32.mrf.mxu2  ;;  %v1763_v54 = vadd.f32 %v1725_v1, %v3502_v34 }
 0x327   : > { %2582 = vst.msk [vmem:[%s3515_s20 + $0x108] sm:$0xff] %vm2548_vm2, %v2545_v10  ;;  %v2010_v59 = vadd.f32 %v1971_v29, %v1762_v58 }
 0x329   : > { %v2258_v14 = vadd.f32 %v2219_v48, %v2010_v59 }
 0x32b   : > { %v2506_v12 = vadd.f32 %v2467_v47, %v2258_v14  ;;  %v2469_v37 = vpop.f32.mrf.mxu0 }
 0x32d   : > { %v2546_v39 = vadd.f32 %v3510_v60, %v2506_v12 }
 0x32e   : > { %v1973_v63 = vpop.f32.mrf.mxu2 }
 0x32f   : > { %2583 = vst.msk [vmem:[%s3515_s20 + $0x110] sm:$0xff] %vm2548_vm2, %v2546_v39  ;;  %v2011_v5 = vadd.f32 %v1973_v63, %v1763_v54 }
 0x331   : > { %v2259_v25 = vadd.f32 %v2221_v49, %v2011_v5 }
 0x333   : > { %v2507_v42 = vadd.f32 %v2469_v37, %v2259_v25 }
 0x335   : > { %v2547_v0 = vadd.f32 %v3510_v60, %v2507_v42 }
 0x337   : > { %2584 = vst.msk [vmem:[%s3515_s20 + $0x118] sm:$0xff] %vm2548_vm2, %v2547_v0 }
 0x338 PF: > { %s13_s14 = sadd.s32 1, %s3023_s14   ;;  %s3711_s12 = smov %s3019_s13 }
 0x339   : > { %p10_p5 = scmp.ge.s32.totalorder %s13_s14, 4   ;;  %s3712_s13 = smov %s3714_s15 }
 0x33b   :  { %12 = sbr.rel (!%p10_p5) target bundleno = 2 (0x2), region = 76 }

</bundles_post_ra>
